<compile_context>
chip_gen: v6e
topology: v6e:2x2x1
jax: 0.10.0
libtpu: 0.0.40
codegen_flags: <defaults>
</compile_context>

<pallas_src>
import functools

import jax
import jax.numpy as jnp
from jax import lax
from jax.experimental import pallas as pl
from jax.experimental.pallas import tpu as pltpu


# ----------------------------------------------------------------------------
# Fused kernel: conv1 (+ReLU+BN) -> dilated conv2 -> gather_2d -> Linear,
# evaluated only at the gathered location's receptive field.
# ----------------------------------------------------------------------------
def _dilator_kernel(loc_ref, *refs, H, W, C, D, P, Wp, dilated):
    if dilated:
        x_ref, w1_ref, vec_ref, w2_ref, wd_ref, bd_ref, o_ref = refs
    else:
        x_ref, w1_ref, vec_ref, wd_ref, bd_ref, o_ref = refs

    b = pl.program_id(0)
    # Clamp: guards the pl.ds loads (PyTorch would error on OOB gather anyway).
    r = jnp.clip(loc_ref[b, 0], 0, H - 1)
    c = jnp.clip(loc_ref[b, 1], 0, W - 1)
    # Flat index (in the padded, flattened input) of x[r-1, c-1].
    base = (r + P - 1) * Wp + (c + P - 1)

    # Tap positions (offsets from (r, c)) whose conv1 output feeds the result.
    taps = ([(dy * D, dx * D) for dy in (-1, 0, 1) for dx in (-1, 0, 1)]
            if dilated else [(0, 0)])
    T = len(taps)

    def load(off):                      # one (1, C) row of the padded input
        return x_ref[0, pl.ds(base + off, 1), :]

    # conv1 at the tap positions: 9 accumulated (T, C) x (C, C) matmuls.
    y1 = None
    for k in range(9):
        ky, kx = divmod(k, 3)
        rows = [load((oy + ky) * Wp + (ox + kx)) for (oy, ox) in taps]
        m_k = rows[0] if T == 1 else jnp.concatenate(rows, axis=0)   # (T, C)
        part = jnp.dot(m_k, w1_ref[k], preferred_element_type=jnp.float32)
        y1 = part if y1 is None else y1 + part
    y1 = y1 + vec_ref[0:1, :]                                        # + b1

    if dilated:
        # ReLU + eval-mode BatchNorm folded into scale/shift.
        a = jnp.maximum(y1, 0.0) * vec_ref[1:2, :] + vec_ref[2:3, :]  # (9, C)
        # conv2 at (r, c): per-tap (1, C) x (C, C) matmuls.  Taps outside the
        # map read conv2's zero padding -> mask their contribution.
        y = vec_ref[3:4, :]                                           # b2
        for t, (oy, ox) in enumerate(taps):
            valid = jnp.logical_and(
                jnp.logical_and(r + oy >= 0, r + oy <= H - 1),
                jnp.logical_and(c + ox >= 0, c + ox <= W - 1),
            ).astype(jnp.float32)
            y = y + valid * jnp.dot(a[t:t + 1, :], w2_ref[t],
                                    preferred_element_type=jnp.float32)
    else:
        y = y1                                                        # (1, C)

    out = (jnp.dot(y, wd_ref[...], preferred_element_type=jnp.float32)
           + bd_ref[...])                                             # (1, Cout)
    o_ref[...] = out.reshape(1, 1, -1).astype(o_ref.dtype)


# ----------------------------------------------------------------------------
# Module wrapper
# ----------------------------------------------------------------------------
def dilator_forward(inp_nchw, loc, params, *, max_dilation):
    x = jnp.transpose(inp_nchw, (0, 2, 3, 1)).astype(jnp.float32)  # NCHW->NHWC
    B, H, W, C = x.shape
    Cout = params["wd"].shape[1]
    dilated = max_dilation > 1
    D = max_dilation
    P = (D + 1) if dilated else 1
    Hp, Wp = H + 2 * P, W + 2 * P

    # Zero halo of width P (implements conv1's pad=1; extra rings only feed
    # taps that get masked).  XLA fuses pad+reshape with the transpose above.
    xp = jnp.pad(x, ((0, 0), (P, P), (P, P), (0, 0)))
    xpf = xp.reshape(B, Hp * Wp, C)

    w1p = params["w1"].astype(jnp.float32).reshape(9, C, C)   # HWIO, tap-major
    wd = params["wd"].astype(jnp.float32)                     # (Cin, Cout)
    bd = params["bd"].reshape(1, Cout).astype(jnp.float32)

    if dilated:
        eps = 1e-5
        scale = params["bn_gamma"] / jnp.sqrt(params["bn_var"] + eps)
        shift = params["bn_beta"] - params["bn_mean"] * scale
        vecs = jnp.stack([params["b1"], scale, shift,
                          params["b2"]]).astype(jnp.float32)          # (4, C)
        w2p = params["w2"].astype(jnp.float32).reshape(9, C, C)
    else:
        vecs = params["b1"].reshape(1, C).astype(jnp.float32)         # (1, C)

    inputs = [xpf, w1p, vecs]
    in_specs = [
        pl.BlockSpec((1, Hp * Wp, C), lambda b, _loc: (b, 0, 0)),
        pl.BlockSpec((9, C, C), lambda b, _loc: (0, 0, 0)),
        pl.BlockSpec((vecs.shape[0], C), lambda b, _loc: (0, 0)),
    ]
    if dilated:
        inputs.append(w2p)
        in_specs.append(pl.BlockSpec((9, C, C), lambda b, _loc: (0, 0, 0)))
    inputs += [wd, bd]
    in_specs += [pl.BlockSpec((C, Cout), lambda b, _loc: (0, 0)),
                 pl.BlockSpec((1, Cout), lambda b, _loc: (0, 0))]

    kernel = functools.partial(_dilator_kernel, H=H, W=W, C=C, D=D, P=P,
                               Wp=Wp, dilated=dilated)

    out = pl.pallas_call(
        kernel,
        out_shape=jax.ShapeDtypeStruct((B, 1, Cout), jnp.float32),
        grid_spec=pltpu.PrefetchScalarGridSpec(
            num_scalar_prefetch=1,            # loc -> SMEM
            grid=(B,),
            in_specs=in_specs,
            out_specs=pl.BlockSpec((1, 1, Cout), lambda b, _loc: (b, 0, 0)),
        ),
        compiler_params=pltpu.CompilerParams(
            dimension_semantics=("parallel",),   # 2 TCs on v7x; serial on v5e/v6e
            vmem_limit_bytes=32 * 1024 * 1024,
        ),
    )(loc.astype(jnp.int32), *inputs)
    return out.reshape(B, Cout)


# ----------------------------------------------------------------------------
# Pure-JAX reference (correctness check only)
# ----------------------------------------------------------------------------
def reference(inp_nchw, loc, params, *, max_dilation):
    dn = ("NCHW", "OIHW", "NCHW")
    w1 = jnp.transpose(params["w1"], (3, 2, 0, 1))
    x = lax.conv_general_dilated(inp_nchw, w1, (1, 1), [(1, 1), (1, 1)],
                                 rhs_dilation=(1, 1), dimension_numbers=dn)
    x = x + params["b1"].reshape(1, -1, 1, 1)
    if max_dilation > 1:
        eps = 1e-5
        scale = params["bn_gamma"] / jnp.sqrt(params["bn_var"] + eps)
        shift = params["bn_beta"] - params["bn_mean"] * scale
        x = jnp.maximum(x, 0.0)
        x = x * scale.reshape(1, -1, 1, 1) + shift.reshape(1, -1, 1, 1)
        w2 = jnp.transpose(params["w2"], (3, 2, 0, 1))
        d = max_dilation
        x = lax.conv_general_dilated(x, w2, (1, 1), [(d, d), (d, d)],
                                     rhs_dilation=(d, d), dimension_numbers=dn)
        x = x + params["b2"].reshape(1, -1, 1, 1)
    B = inp_nchw.shape[0]
    g = x[jnp.arange(B), :, loc[:, 0], loc[:, 1]]          # (B, C)
    return g @ params["wd"] + params["bd"]


if __name__ == "__main__":
    B, Cin, Cout, H, W = 4, 4, 8, 16, 16

    key = jax.random.PRNGKey(0)
    keys = jax.random.split(key, 9)
    params = {
        "w1": 0.1 * jax.random.normal(keys[0], (3, 3, Cin, Cin), jnp.float32),
        "b1": 0.1 * jax.random.normal(keys[1], (Cin,), jnp.float32),
        "w2": 0.1 * jax.random.normal(keys[2], (3, 3, Cin, Cin), jnp.float32),
        "b2": 0.1 * jax.random.normal(keys[3], (Cin,), jnp.float32),
        "bn_gamma": 1.0 + 0.1 * jax.random.normal(keys[4], (Cin,), jnp.float32),
        "bn_beta": 0.1 * jax.random.normal(keys[5], (Cin,), jnp.float32),
        "bn_mean": jnp.zeros((Cin,), jnp.float32),
        "bn_var": jnp.ones((Cin,), jnp.float32),
        "wd": 0.1 * jax.random.normal(keys[6], (Cin, Cout), jnp.float32),
        "bd": 0.1 * jax.random.normal(keys[7], (Cout,), jnp.float32),
    }

    inp = jax.random.normal(keys[8], (B, Cin, H, W), jnp.float32)   # NCHW
    # Border locations exercise conv1 zero-padding and conv2 tap masking.
    loc = jnp.array([[0, 0], [H - 1, W - 1], [0, W - 1], [7, 3]], jnp.int32)

    # Exercise both the dilated (conv1+ReLU+BN+conv2) and the plain path.
    for md in (2, 1):
        out = dilator_forward(inp, loc, params, max_dilation=md)
        out = jax.block_until_ready(out)
        ref = reference(inp, loc, params, max_dilation=md)
        assert out.shape == (B, Cout), (md, out.shape)
        assert jnp.allclose(out, ref, atol=1e-4, rtol=1e-4), (md, out, ref)

    print("KERNEL_OK")
</pallas_src>

<mosaic_0001>
module attributes {stable_mosaic.version = 11 : i64} {
  func.func @_dilator_kernel(%arg0: i32, %arg1: memref<4x2xi32, #tpu.memory_space<smem>>, %arg2: memref<1x484x4xf32, #tpu.memory_space<vmem>>, %arg3: memref<9x4x4xf32, #tpu.memory_space<vmem>>, %arg4: memref<4x4xf32, #tpu.memory_space<vmem>>, %arg5: memref<9x4x4xf32, #tpu.memory_space<vmem>>, %arg6: memref<4x8xf32, #tpu.memory_space<vmem>>, %arg7: memref<1x8xf32, #tpu.memory_space<vmem>>, %arg8: memref<1x1x8xf32, #tpu.memory_space<vmem>>) attributes {dimension_semantics = [#tpu.dimension_semantics<parallel>], iteration_bounds = array<i64: 4>, scalar_prefetch = 1 : i64, scratch_operands = 0 : i64, tpu.core_type = #tpu.core_type<tc>, window_params = [{transform_indices = @transform_0, window_bounds = array<i64: 1, 484, 4>}, {pipeline_mode = #tpu.pipeline_mode<synchronous>, transform_indices = @transform_1, window_bounds = array<i64: 9, 4, 4>}, {pipeline_mode = #tpu.pipeline_mode<synchronous>, transform_indices = @transform_2, window_bounds = array<i64: 4, 4>}, {pipeline_mode = #tpu.pipeline_mode<synchronous>, transform_indices = @transform_3, window_bounds = array<i64: 9, 4, 4>}, {pipeline_mode = #tpu.pipeline_mode<synchronous>, transform_indices = @transform_4, window_bounds = array<i64: 4, 8>}, {pipeline_mode = #tpu.pipeline_mode<synchronous>, transform_indices = @transform_5, window_bounds = array<i64: 1, 8>}, {transform_indices = @transform_6, window_bounds = array<i64: 1, 1, 8>}]} {
    %0 = arith.index_cast %arg0 : i32 to index
    %c0 = arith.constant 0 : index
    %1 = memref.load %arg1[%0, %c0] : memref<4x2xi32, #tpu.memory_space<smem>>
    %c0_i32 = arith.constant 0 : i32
    %c15_i32 = arith.constant 15 : i32
    %2 = arith.maxsi %c0_i32, %1 : i32
    %3 = arith.minsi %c15_i32, %2 : i32
    %4 = arith.index_cast %arg0 : i32 to index
    %c1 = arith.constant 1 : index
    %5 = memref.load %arg1[%4, %c1] : memref<4x2xi32, #tpu.memory_space<smem>>
    %c0_i32_0 = arith.constant 0 : i32
    %c15_i32_1 = arith.constant 15 : i32
    %6 = arith.maxsi %c0_i32_0, %5 : i32
    %7 = arith.minsi %c15_i32_1, %6 : i32
    %c3_i32 = arith.constant 3 : i32
    %8 = arith.addi %3, %c3_i32 : i32
    %c1_i32 = arith.constant 1 : i32
    %9 = arith.subi %8, %c1_i32 : i32
    %c22_i32 = arith.constant 22 : i32
    %10 = arith.muli %9, %c22_i32 : i32
    %c3_i32_2 = arith.constant 3 : i32
    %11 = arith.addi %7, %c3_i32_2 : i32
    %c1_i32_3 = arith.constant 1 : i32
    %12 = arith.subi %11, %c1_i32_3 : i32
    %13 = arith.addi %10, %12 : i32
    %c-46_i32 = arith.constant -46 : i32
    %14 = arith.addi %13, %c-46_i32 : i32
    %c0_4 = arith.constant 0 : index
    %15 = arith.index_cast %14 : i32 to index
    %c0_5 = arith.constant 0 : index
    %16 = vector.load %arg2[%c0_4, %15, %c0_5] : memref<1x484x4xf32, #tpu.memory_space<vmem>>, vector<1x1x4xf32>
    %17 = vector.shape_cast %16 : vector<1x1x4xf32> to vector<1x4xf32>
    %c-44_i32 = arith.constant -44 : i32
    %18 = arith.addi %13, %c-44_i32 : i32
    %c0_6 = arith.constant 0 : index
    %19 = arith.index_cast %18 : i32 to index
    %c0_7 = arith.constant 0 : index
    %20 = vector.load %arg2[%c0_6, %19, %c0_7] : memref<1x484x4xf32, #tpu.memory_space<vmem>>, vector<1x1x4xf32>
    %21 = vector.shape_cast %20 : vector<1x1x4xf32> to vector<1x4xf32>
    %c-42_i32 = arith.constant -42 : i32
    %22 = arith.addi %13, %c-42_i32 : i32
    %c0_8 = arith.constant 0 : index
    %23 = arith.index_cast %22 : i32 to index
    %c0_9 = arith.constant 0 : index
    %24 = vector.load %arg2[%c0_8, %23, %c0_9] : memref<1x484x4xf32, #tpu.memory_space<vmem>>, vector<1x1x4xf32>
    %25 = vector.shape_cast %24 : vector<1x1x4xf32> to vector<1x4xf32>
    %c-2_i32 = arith.constant -2 : i32
    %26 = arith.addi %13, %c-2_i32 : i32
    %c0_10 = arith.constant 0 : index
    %27 = arith.index_cast %26 : i32 to index
    %c0_11 = arith.constant 0 : index
    %28 = vector.load %arg2[%c0_10, %27, %c0_11] : memref<1x484x4xf32, #tpu.memory_space<vmem>>, vector<1x1x4xf32>
    %29 = vector.shape_cast %28 : vector<1x1x4xf32> to vector<1x4xf32>
    %c0_i32_12 = arith.constant 0 : i32
    %30 = arith.addi %13, %c0_i32_12 : i32
    %c0_13 = arith.constant 0 : index
    %31 = arith.index_cast %30 : i32 to index
    %c0_14 = arith.constant 0 : index
    %32 = vector.load %arg2[%c0_13, %31, %c0_14] : memref<1x484x4xf32, #tpu.memory_space<vmem>>, vector<1x1x4xf32>
    %33 = vector.shape_cast %32 : vector<1x1x4xf32> to vector<1x4xf32>
    %c2_i32 = arith.constant 2 : i32
    %34 = arith.addi %13, %c2_i32 : i32
    %c0_15 = arith.constant 0 : index
    %35 = arith.index_cast %34 : i32 to index
    %c0_16 = arith.constant 0 : index
    %36 = vector.load %arg2[%c0_15, %35, %c0_16] : memref<1x484x4xf32, #tpu.memory_space<vmem>>, vector<1x1x4xf32>
    %37 = vector.shape_cast %36 : vector<1x1x4xf32> to vector<1x4xf32>
    %c42_i32 = arith.constant 42 : i32
    %38 = arith.addi %13, %c42_i32 : i32
    %c0_17 = arith.constant 0 : index
    %39 = arith.index_cast %38 : i32 to index
    %c0_18 = arith.constant 0 : index
    %40 = vector.load %arg2[%c0_17, %39, %c0_18] : memref<1x484x4xf32, #tpu.memory_space<vmem>>, vector<1x1x4xf32>
    %41 = vector.shape_cast %40 : vector<1x1x4xf32> to vector<1x4xf32>
    %c44_i32 = arith.constant 44 : i32
    %42 = arith.addi %13, %c44_i32 : i32
    %c0_19 = arith.constant 0 : index
    %43 = arith.index_cast %42 : i32 to index
    %c0_20 = arith.constant 0 : index
    %44 = vector.load %arg2[%c0_19, %43, %c0_20] : memref<1x484x4xf32, #tpu.memory_space<vmem>>, vector<1x1x4xf32>
    %45 = vector.shape_cast %44 : vector<1x1x4xf32> to vector<1x4xf32>
    %c46_i32 = arith.constant 46 : i32
    %46 = arith.addi %13, %c46_i32 : i32
    %c0_21 = arith.constant 0 : index
    %47 = arith.index_cast %46 : i32 to index
    %c0_22 = arith.constant 0 : index
    %48 = vector.load %arg2[%c0_21, %47, %c0_22] : memref<1x484x4xf32, #tpu.memory_space<vmem>>, vector<1x1x4xf32>
    %49 = vector.shape_cast %48 : vector<1x1x4xf32> to vector<1x4xf32>
    %50 = tpu.concatenate %17, %21, %25, %29, %33, %37, %41, %45, %49 in 0 : vector<1x4xf32>, vector<1x4xf32>, vector<1x4xf32>, vector<1x4xf32>, vector<1x4xf32>, vector<1x4xf32>, vector<1x4xf32>, vector<1x4xf32>, vector<1x4xf32> -> vector<9x4xf32>
    %c0_23 = arith.constant 0 : index
    %c0_24 = arith.constant 0 : index
    %c0_25 = arith.constant 0 : index
    %51 = vector.load %arg3[%c0_23, %c0_24, %c0_25] : memref<9x4x4xf32, #tpu.memory_space<vmem>>, vector<1x4x4xf32>
    %52 = vector.shape_cast %51 : vector<1x4x4xf32> to vector<4x4xf32>
    %cst = arith.constant dense<0.000000e+00> : vector<9x4xf32>
    %53 = tpu.matmul %50, %52, %cst {dimension_numbers = #tpu.dot_dimension_numbers<[1], [0], [0], [1], [0, 0, 1, 1], [], []>} : vector<9x4xf32>, vector<4x4xf32>, vector<9x4xf32> -> vector<9x4xf32>
    %c-45_i32 = arith.constant -45 : i32
    %54 = arith.addi %13, %c-45_i32 : i32
    %c0_26 = arith.constant 0 : index
    %55 = arith.index_cast %54 : i32 to index
    %c0_27 = arith.constant 0 : index
    %56 = vector.load %arg2[%c0_26, %55, %c0_27] : memref<1x484x4xf32, #tpu.memory_space<vmem>>, vector<1x1x4xf32>
    %57 = vector.shape_cast %56 : vector<1x1x4xf32> to vector<1x4xf32>
    %c-43_i32 = arith.constant -43 : i32
    %58 = arith.addi %13, %c-43_i32 : i32
    %c0_28 = arith.constant 0 : index
    %59 = arith.index_cast %58 : i32 to index
    %c0_29 = arith.constant 0 : index
    %60 = vector.load %arg2[%c0_28, %59, %c0_29] : memref<1x484x4xf32, #tpu.memory_space<vmem>>, vector<1x1x4xf32>
    %61 = vector.shape_cast %60 : vector<1x1x4xf32> to vector<1x4xf32>
    %c-41_i32 = arith.constant -41 : i32
    %62 = arith.addi %13, %c-41_i32 : i32
    %c0_30 = arith.constant 0 : index
    %63 = arith.index_cast %62 : i32 to index
    %c0_31 = arith.constant 0 : index
    %64 = vector.load %arg2[%c0_30, %63, %c0_31] : memref<1x484x4xf32, #tpu.memory_space<vmem>>, vector<1x1x4xf32>
    %65 = vector.shape_cast %64 : vector<1x1x4xf32> to vector<1x4xf32>
    %c-1_i32 = arith.constant -1 : i32
    %66 = arith.addi %13, %c-1_i32 : i32
    %c0_32 = arith.constant 0 : index
    %67 = arith.index_cast %66 : i32 to index
    %c0_33 = arith.constant 0 : index
    %68 = vector.load %arg2[%c0_32, %67, %c0_33] : memref<1x484x4xf32, #tpu.memory_space<vmem>>, vector<1x1x4xf32>
    %69 = vector.shape_cast %68 : vector<1x1x4xf32> to vector<1x4xf32>
    %c1_i32_34 = arith.constant 1 : i32
    %70 = arith.addi %13, %c1_i32_34 : i32
    %c0_35 = arith.constant 0 : index
    %71 = arith.index_cast %70 : i32 to index
    %c0_36 = arith.constant 0 : index
    %72 = vector.load %arg2[%c0_35, %71, %c0_36] : memref<1x484x4xf32, #tpu.memory_space<vmem>>, vector<1x1x4xf32>
    %73 = vector.shape_cast %72 : vector<1x1x4xf32> to vector<1x4xf32>
    %c3_i32_37 = arith.constant 3 : i32
    %74 = arith.addi %13, %c3_i32_37 : i32
    %c0_38 = arith.constant 0 : index
    %75 = arith.index_cast %74 : i32 to index
    %c0_39 = arith.constant 0 : index
    %76 = vector.load %arg2[%c0_38, %75, %c0_39] : memref<1x484x4xf32, #tpu.memory_space<vmem>>, vector<1x1x4xf32>
    %77 = vector.shape_cast %76 : vector<1x1x4xf32> to vector<1x4xf32>
    %c43_i32 = arith.constant 43 : i32
    %78 = arith.addi %13, %c43_i32 : i32
    %c0_40 = arith.constant 0 : index
    %79 = arith.index_cast %78 : i32 to index
    %c0_41 = arith.constant 0 : index
    %80 = vector.load %arg2[%c0_40, %79, %c0_41] : memref<1x484x4xf32, #tpu.memory_space<vmem>>, vector<1x1x4xf32>
    %81 = vector.shape_cast %80 : vector<1x1x4xf32> to vector<1x4xf32>
    %c45_i32 = arith.constant 45 : i32
    %82 = arith.addi %13, %c45_i32 : i32
    %c0_42 = arith.constant 0 : index
    %83 = arith.index_cast %82 : i32 to index
    %c0_43 = arith.constant 0 : index
    %84 = vector.load %arg2[%c0_42, %83, %c0_43] : memref<1x484x4xf32, #tpu.memory_space<vmem>>, vector<1x1x4xf32>
    %85 = vector.shape_cast %84 : vector<1x1x4xf32> to vector<1x4xf32>
    %c47_i32 = arith.constant 47 : i32
    %86 = arith.addi %13, %c47_i32 : i32
    %c0_44 = arith.constant 0 : index
    %87 = arith.index_cast %86 : i32 to index
    %c0_45 = arith.constant 0 : index
    %88 = vector.load %arg2[%c0_44, %87, %c0_45] : memref<1x484x4xf32, #tpu.memory_space<vmem>>, vector<1x1x4xf32>
    %89 = vector.shape_cast %88 : vector<1x1x4xf32> to vector<1x4xf32>
    %90 = tpu.concatenate %57, %61, %65, %69, %73, %77, %81, %85, %89 in 0 : vector<1x4xf32>, vector<1x4xf32>, vector<1x4xf32>, vector<1x4xf32>, vector<1x4xf32>, vector<1x4xf32>, vector<1x4xf32>, vector<1x4xf32>, vector<1x4xf32> -> vector<9x4xf32>
    %c1_46 = arith.constant 1 : index
    %c0_47 = arith.constant 0 : index
    %c0_48 = arith.constant 0 : index
    %91 = vector.load %arg3[%c1_46, %c0_47, %c0_48] : memref<9x4x4xf32, #tpu.memory_space<vmem>>, vector<1x4x4xf32>
    %92 = vector.shape_cast %91 : vector<1x4x4xf32> to vector<4x4xf32>
    %cst_49 = arith.constant dense<0.000000e+00> : vector<9x4xf32>
    %93 = tpu.matmul %90, %92, %cst_49 {dimension_numbers = #tpu.dot_dimension_numbers<[1], [0], [0], [1], [0, 0, 1, 1], [], []>} : vector<9x4xf32>, vector<4x4xf32>, vector<9x4xf32> -> vector<9x4xf32>
    %94 = arith.addf %53, %93 : vector<9x4xf32>
    %c-44_i32_50 = arith.constant -44 : i32
    %95 = arith.addi %13, %c-44_i32_50 : i32
    %c0_51 = arith.constant 0 : index
    %96 = arith.index_cast %95 : i32 to index
    %c0_52 = arith.constant 0 : index
    %97 = vector.load %arg2[%c0_51, %96, %c0_52] : memref<1x484x4xf32, #tpu.memory_space<vmem>>, vector<1x1x4xf32>
    %98 = vector.shape_cast %97 : vector<1x1x4xf32> to vector<1x4xf32>
    %c-42_i32_53 = arith.constant -42 : i32
    %99 = arith.addi %13, %c-42_i32_53 : i32
    %c0_54 = arith.constant 0 : index
    %100 = arith.index_cast %99 : i32 to index
    %c0_55 = arith.constant 0 : index
    %101 = vector.load %arg2[%c0_54, %100, %c0_55] : memref<1x484x4xf32, #tpu.memory_space<vmem>>, vector<1x1x4xf32>
    %102 = vector.shape_cast %101 : vector<1x1x4xf32> to vector<1x4xf32>
    %c-40_i32 = arith.constant -40 : i32
    %103 = arith.addi %13, %c-40_i32 : i32
    %c0_56 = arith.constant 0 : index
    %104 = arith.index_cast %103 : i32 to index
    %c0_57 = arith.constant 0 : index
    %105 = vector.load %arg2[%c0_56, %104, %c0_57] : memref<1x484x4xf32, #tpu.memory_space<vmem>>, vector<1x1x4xf32>
    %106 = vector.shape_cast %105 : vector<1x1x4xf32> to vector<1x4xf32>
    %c0_i32_58 = arith.constant 0 : i32
    %107 = arith.addi %13, %c0_i32_58 : i32
    %c0_59 = arith.constant 0 : index
    %108 = arith.index_cast %107 : i32 to index
    %c0_60 = arith.constant 0 : index
    %109 = vector.load %arg2[%c0_59, %108, %c0_60] : memref<1x484x4xf32, #tpu.memory_space<vmem>>, vector<1x1x4xf32>
    %110 = vector.shape_cast %109 : vector<1x1x4xf32> to vector<1x4xf32>
    %c2_i32_61 = arith.constant 2 : i32
    %111 = arith.addi %13, %c2_i32_61 : i32
    %c0_62 = arith.constant 0 : index
    %112 = arith.index_cast %111 : i32 to index
    %c0_63 = arith.constant 0 : index
    %113 = vector.load %arg2[%c0_62, %112, %c0_63] : memref<1x484x4xf32, #tpu.memory_space<vmem>>, vector<1x1x4xf32>
    %114 = vector.shape_cast %113 : vector<1x1x4xf32> to vector<1x4xf32>
    %c4_i32 = arith.constant 4 : i32
    %115 = arith.addi %13, %c4_i32 : i32
    %c0_64 = arith.constant 0 : index
    %116 = arith.index_cast %115 : i32 to index
    %c0_65 = arith.constant 0 : index
    %117 = vector.load %arg2[%c0_64, %116, %c0_65] : memref<1x484x4xf32, #tpu.memory_space<vmem>>, vector<1x1x4xf32>
    %118 = vector.shape_cast %117 : vector<1x1x4xf32> to vector<1x4xf32>
    %c44_i32_66 = arith.constant 44 : i32
    %119 = arith.addi %13, %c44_i32_66 : i32
    %c0_67 = arith.constant 0 : index
    %120 = arith.index_cast %119 : i32 to index
    %c0_68 = arith.constant 0 : index
    %121 = vector.load %arg2[%c0_67, %120, %c0_68] : memref<1x484x4xf32, #tpu.memory_space<vmem>>, vector<1x1x4xf32>
    %122 = vector.shape_cast %121 : vector<1x1x4xf32> to vector<1x4xf32>
    %c46_i32_69 = arith.constant 46 : i32
    %123 = arith.addi %13, %c46_i32_69 : i32
    %c0_70 = arith.constant 0 : index
    %124 = arith.index_cast %123 : i32 to index
    %c0_71 = arith.constant 0 : index
    %125 = vector.load %arg2[%c0_70, %124, %c0_71] : memref<1x484x4xf32, #tpu.memory_space<vmem>>, vector<1x1x4xf32>
    %126 = vector.shape_cast %125 : vector<1x1x4xf32> to vector<1x4xf32>
    %c48_i32 = arith.constant 48 : i32
    %127 = arith.addi %13, %c48_i32 : i32
    %c0_72 = arith.constant 0 : index
    %128 = arith.index_cast %127 : i32 to index
    %c0_73 = arith.constant 0 : index
    %129 = vector.load %arg2[%c0_72, %128, %c0_73] : memref<1x484x4xf32, #tpu.memory_space<vmem>>, vector<1x1x4xf32>
    %130 = vector.shape_cast %129 : vector<1x1x4xf32> to vector<1x4xf32>
    %131 = tpu.concatenate %98, %102, %106, %110, %114, %118, %122, %126, %130 in 0 : vector<1x4xf32>, vector<1x4xf32>, vector<1x4xf32>, vector<1x4xf32>, vector<1x4xf32>, vector<1x4xf32>, vector<1x4xf32>, vector<1x4xf32>, vector<1x4xf32> -> vector<9x4xf32>
    %c2 = arith.constant 2 : index
    %c0_74 = arith.constant 0 : index
    %c0_75 = arith.constant 0 : index
    %132 = vector.load %arg3[%c2, %c0_74, %c0_75] : memref<9x4x4xf32, #tpu.memory_space<vmem>>, vector<1x4x4xf32>
    %133 = vector.shape_cast %132 : vector<1x4x4xf32> to vector<4x4xf32>
    %cst_76 = arith.constant dense<0.000000e+00> : vector<9x4xf32>
    %134 = tpu.matmul %131, %133, %cst_76 {dimension_numbers = #tpu.dot_dimension_numbers<[1], [0], [0], [1], [0, 0, 1, 1], [], []>} : vector<9x4xf32>, vector<4x4xf32>, vector<9x4xf32> -> vector<9x4xf32>
    %135 = arith.addf %94, %134 : vector<9x4xf32>
    %c-24_i32 = arith.constant -24 : i32
    %136 = arith.addi %13, %c-24_i32 : i32
    %c0_77 = arith.constant 0 : index
    %137 = arith.index_cast %136 : i32 to index
    %c0_78 = arith.constant 0 : index
    %138 = vector.load %arg2[%c0_77, %137, %c0_78] : memref<1x484x4xf32, #tpu.memory_space<vmem>>, vector<1x1x4xf32>
    %139 = vector.shape_cast %138 : vector<1x1x4xf32> to vector<1x4xf32>
    %c-22_i32 = arith.constant -22 : i32
    %140 = arith.addi %13, %c-22_i32 : i32
    %c0_79 = arith.constant 0 : index
    %141 = arith.index_cast %140 : i32 to index
    %c0_80 = arith.constant 0 : index
    %142 = vector.load %arg2[%c0_79, %141, %c0_80] : memref<1x484x4xf32, #tpu.memory_space<vmem>>, vector<1x1x4xf32>
    %143 = vector.shape_cast %142 : vector<1x1x4xf32> to vector<1x4xf32>
    %c-20_i32 = arith.constant -20 : i32
    %144 = arith.addi %13, %c-20_i32 : i32
    %c0_81 = arith.constant 0 : index
    %145 = arith.index_cast %144 : i32 to index
    %c0_82 = arith.constant 0 : index
    %146 = vector.load %arg2[%c0_81, %145, %c0_82] : memref<1x484x4xf32, #tpu.memory_space<vmem>>, vector<1x1x4xf32>
    %147 = vector.shape_cast %146 : vector<1x1x4xf32> to vector<1x4xf32>
    %c20_i32 = arith.constant 20 : i32
    %148 = arith.addi %13, %c20_i32 : i32
    %c0_83 = arith.constant 0 : index
    %149 = arith.index_cast %148 : i32 to index
    %c0_84 = arith.constant 0 : index
    %150 = vector.load %arg2[%c0_83, %149, %c0_84] : memref<1x484x4xf32, #tpu.memory_space<vmem>>, vector<1x1x4xf32>
    %151 = vector.shape_cast %150 : vector<1x1x4xf32> to vector<1x4xf32>
    %c22_i32_85 = arith.constant 22 : i32
    %152 = arith.addi %13, %c22_i32_85 : i32
    %c0_86 = arith.constant 0 : index
    %153 = arith.index_cast %152 : i32 to index
    %c0_87 = arith.constant 0 : index
    %154 = vector.load %arg2[%c0_86, %153, %c0_87] : memref<1x484x4xf32, #tpu.memory_space<vmem>>, vector<1x1x4xf32>
    %155 = vector.shape_cast %154 : vector<1x1x4xf32> to vector<1x4xf32>
    %c24_i32 = arith.constant 24 : i32
    %156 = arith.addi %13, %c24_i32 : i32
    %c0_88 = arith.constant 0 : index
    %157 = arith.index_cast %156 : i32 to index
    %c0_89 = arith.constant 0 : index
    %158 = vector.load %arg2[%c0_88, %157, %c0_89] : memref<1x484x4xf32, #tpu.memory_space<vmem>>, vector<1x1x4xf32>
    %159 = vector.shape_cast %158 : vector<1x1x4xf32> to vector<1x4xf32>
    %c64_i32 = arith.constant 64 : i32
    %160 = arith.addi %13, %c64_i32 : i32
    %c0_90 = arith.constant 0 : index
    %161 = arith.index_cast %160 : i32 to index
    %c0_91 = arith.constant 0 : index
    %162 = vector.load %arg2[%c0_90, %161, %c0_91] : memref<1x484x4xf32, #tpu.memory_space<vmem>>, vector<1x1x4xf32>
    %163 = vector.shape_cast %162 : vector<1x1x4xf32> to vector<1x4xf32>
    %c66_i32 = arith.constant 66 : i32
    %164 = arith.addi %13, %c66_i32 : i32
    %c0_92 = arith.constant 0 : index
    %165 = arith.index_cast %164 : i32 to index
    %c0_93 = arith.constant 0 : index
    %166 = vector.load %arg2[%c0_92, %165, %c0_93] : memref<1x484x4xf32, #tpu.memory_space<vmem>>, vector<1x1x4xf32>
    %167 = vector.shape_cast %166 : vector<1x1x4xf32> to vector<1x4xf32>
    %c68_i32 = arith.constant 68 : i32
    %168 = arith.addi %13, %c68_i32 : i32
    %c0_94 = arith.constant 0 : index
    %169 = arith.index_cast %168 : i32 to index
    %c0_95 = arith.constant 0 : index
    %170 = vector.load %arg2[%c0_94, %169, %c0_95] : memref<1x484x4xf32, #tpu.memory_space<vmem>>, vector<1x1x4xf32>
    %171 = vector.shape_cast %170 : vector<1x1x4xf32> to vector<1x4xf32>
    %172 = tpu.concatenate %139, %143, %147, %151, %155, %159, %163, %167, %171 in 0 : vector<1x4xf32>, vector<1x4xf32>, vector<1x4xf32>, vector<1x4xf32>, vector<1x4xf32>, vector<1x4xf32>, vector<1x4xf32>, vector<1x4xf32>, vector<1x4xf32> -> vector<9x4xf32>
    %c3 = arith.constant 3 : index
    %c0_96 = arith.constant 0 : index
    %c0_97 = arith.constant 0 : index
    %173 = vector.load %arg3[%c3, %c0_96, %c0_97] : memref<9x4x4xf32, #tpu.memory_space<vmem>>, vector<1x4x4xf32>
    %174 = vector.shape_cast %173 : vector<1x4x4xf32> to vector<4x4xf32>
    %cst_98 = arith.constant dense<0.000000e+00> : vector<9x4xf32>
    %175 = tpu.matmul %172, %174, %cst_98 {dimension_numbers = #tpu.dot_dimension_numbers<[1], [0], [0], [1], [0, 0, 1, 1], [], []>} : vector<9x4xf32>, vector<4x4xf32>, vector<9x4xf32> -> vector<9x4xf32>
    %176 = arith.addf %135, %175 : vector<9x4xf32>
    %c-23_i32 = arith.constant -23 : i32
    %177 = arith.addi %13, %c-23_i32 : i32
    %c0_99 = arith.constant 0 : index
    %178 = arith.index_cast %177 : i32 to index
    %c0_100 = arith.constant 0 : index
    %179 = vector.load %arg2[%c0_99, %178, %c0_100] : memref<1x484x4xf32, #tpu.memory_space<vmem>>, vector<1x1x4xf32>
    %180 = vector.shape_cast %179 : vector<1x1x4xf32> to vector<1x4xf32>
    %c-21_i32 = arith.constant -21 : i32
    %181 = arith.addi %13, %c-21_i32 : i32
    %c0_101 = arith.constant 0 : index
    %182 = arith.index_cast %181 : i32 to index
    %c0_102 = arith.constant 0 : index
    %183 = vector.load %arg2[%c0_101, %182, %c0_102] : memref<1x484x4xf32, #tpu.memory_space<vmem>>, vector<1x1x4xf32>
    %184 = vector.shape_cast %183 : vector<1x1x4xf32> to vector<1x4xf32>
    %c-19_i32 = arith.constant -19 : i32
    %185 = arith.addi %13, %c-19_i32 : i32
    %c0_103 = arith.constant 0 : index
    %186 = arith.index_cast %185 : i32 to index
    %c0_104 = arith.constant 0 : index
    %187 = vector.load %arg2[%c0_103, %186, %c0_104] : memref<1x484x4xf32, #tpu.memory_space<vmem>>, vector<1x1x4xf32>
    %188 = vector.shape_cast %187 : vector<1x1x4xf32> to vector<1x4xf32>
    %c21_i32 = arith.constant 21 : i32
    %189 = arith.addi %13, %c21_i32 : i32
    %c0_105 = arith.constant 0 : index
    %190 = arith.index_cast %189 : i32 to index
    %c0_106 = arith.constant 0 : index
    %191 = vector.load %arg2[%c0_105, %190, %c0_106] : memref<1x484x4xf32, #tpu.memory_space<vmem>>, vector<1x1x4xf32>
    %192 = vector.shape_cast %191 : vector<1x1x4xf32> to vector<1x4xf32>
    %c23_i32 = arith.constant 23 : i32
    %193 = arith.addi %13, %c23_i32 : i32
    %c0_107 = arith.constant 0 : index
    %194 = arith.index_cast %193 : i32 to index
    %c0_108 = arith.constant 0 : index
    %195 = vector.load %arg2[%c0_107, %194, %c0_108] : memref<1x484x4xf32, #tpu.memory_space<vmem>>, vector<1x1x4xf32>
    %196 = vector.shape_cast %195 : vector<1x1x4xf32> to vector<1x4xf32>
    %c25_i32 = arith.constant 25 : i32
    %197 = arith.addi %13, %c25_i32 : i32
    %c0_109 = arith.constant 0 : index
    %198 = arith.index_cast %197 : i32 to index
    %c0_110 = arith.constant 0 : index
    %199 = vector.load %arg2[%c0_109, %198, %c0_110] : memref<1x484x4xf32, #tpu.memory_space<vmem>>, vector<1x1x4xf32>
    %200 = vector.shape_cast %199 : vector<1x1x4xf32> to vector<1x4xf32>
    %c65_i32 = arith.constant 65 : i32
    %201 = arith.addi %13, %c65_i32 : i32
    %c0_111 = arith.constant 0 : index
    %202 = arith.index_cast %201 : i32 to index
    %c0_112 = arith.constant 0 : index
    %203 = vector.load %arg2[%c0_111, %202, %c0_112] : memref<1x484x4xf32, #tpu.memory_space<vmem>>, vector<1x1x4xf32>
    %204 = vector.shape_cast %203 : vector<1x1x4xf32> to vector<1x4xf32>
    %c67_i32 = arith.constant 67 : i32
    %205 = arith.addi %13, %c67_i32 : i32
    %c0_113 = arith.constant 0 : index
    %206 = arith.index_cast %205 : i32 to index
    %c0_114 = arith.constant 0 : index
    %207 = vector.load %arg2[%c0_113, %206, %c0_114] : memref<1x484x4xf32, #tpu.memory_space<vmem>>, vector<1x1x4xf32>
    %208 = vector.shape_cast %207 : vector<1x1x4xf32> to vector<1x4xf32>
    %c69_i32 = arith.constant 69 : i32
    %209 = arith.addi %13, %c69_i32 : i32
    %c0_115 = arith.constant 0 : index
    %210 = arith.index_cast %209 : i32 to index
    %c0_116 = arith.constant 0 : index
    %211 = vector.load %arg2[%c0_115, %210, %c0_116] : memref<1x484x4xf32, #tpu.memory_space<vmem>>, vector<1x1x4xf32>
    %212 = vector.shape_cast %211 : vector<1x1x4xf32> to vector<1x4xf32>
    %213 = tpu.concatenate %180, %184, %188, %192, %196, %200, %204, %208, %212 in 0 : vector<1x4xf32>, vector<1x4xf32>, vector<1x4xf32>, vector<1x4xf32>, vector<1x4xf32>, vector<1x4xf32>, vector<1x4xf32>, vector<1x4xf32>, vector<1x4xf32> -> vector<9x4xf32>
    %c4 = arith.constant 4 : index
    %c0_117 = arith.constant 0 : index
    %c0_118 = arith.constant 0 : index
    %214 = vector.load %arg3[%c4, %c0_117, %c0_118] : memref<9x4x4xf32, #tpu.memory_space<vmem>>, vector<1x4x4xf32>
    %215 = vector.shape_cast %214 : vector<1x4x4xf32> to vector<4x4xf32>
    %cst_119 = arith.constant dense<0.000000e+00> : vector<9x4xf32>
    %216 = tpu.matmul %213, %215, %cst_119 {dimension_numbers = #tpu.dot_dimension_numbers<[1], [0], [0], [1], [0, 0, 1, 1], [], []>} : vector<9x4xf32>, vector<4x4xf32>, vector<9x4xf32> -> vector<9x4xf32>
    %217 = arith.addf %176, %216 : vector<9x4xf32>
    %c-22_i32_120 = arith.constant -22 : i32
    %218 = arith.addi %13, %c-22_i32_120 : i32
    %c0_121 = arith.constant 0 : index
    %219 = arith.index_cast %218 : i32 to index
    %c0_122 = arith.constant 0 : index
    %220 = vector.load %arg2[%c0_121, %219, %c0_122] : memref<1x484x4xf32, #tpu.memory_space<vmem>>, vector<1x1x4xf32>
    %221 = vector.shape_cast %220 : vector<1x1x4xf32> to vector<1x4xf32>
    %c-20_i32_123 = arith.constant -20 : i32
    %222 = arith.addi %13, %c-20_i32_123 : i32
    %c0_124 = arith.constant 0 : index
    %223 = arith.index_cast %222 : i32 to index
    %c0_125 = arith.constant 0 : index
    %224 = vector.load %arg2[%c0_124, %223, %c0_125] : memref<1x484x4xf32, #tpu.memory_space<vmem>>, vector<1x1x4xf32>
    %225 = vector.shape_cast %224 : vector<1x1x4xf32> to vector<1x4xf32>
    %c-18_i32 = arith.constant -18 : i32
    %226 = arith.addi %13, %c-18_i32 : i32
    %c0_126 = arith.constant 0 : index
    %227 = arith.index_cast %226 : i32 to index
    %c0_127 = arith.constant 0 : index
    %228 = vector.load %arg2[%c0_126, %227, %c0_127] : memref<1x484x4xf32, #tpu.memory_space<vmem>>, vector<1x1x4xf32>
    %229 = vector.shape_cast %228 : vector<1x1x4xf32> to vector<1x4xf32>
    %c22_i32_128 = arith.constant 22 : i32
    %230 = arith.addi %13, %c22_i32_128 : i32
    %c0_129 = arith.constant 0 : index
    %231 = arith.index_cast %230 : i32 to index
    %c0_130 = arith.constant 0 : index
    %232 = vector.load %arg2[%c0_129, %231, %c0_130] : memref<1x484x4xf32, #tpu.memory_space<vmem>>, vector<1x1x4xf32>
    %233 = vector.shape_cast %232 : vector<1x1x4xf32> to vector<1x4xf32>
    %c24_i32_131 = arith.constant 24 : i32
    %234 = arith.addi %13, %c24_i32_131 : i32
    %c0_132 = arith.constant 0 : index
    %235 = arith.index_cast %234 : i32 to index
    %c0_133 = arith.constant 0 : index
    %236 = vector.load %arg2[%c0_132, %235, %c0_133] : memref<1x484x4xf32, #tpu.memory_space<vmem>>, vector<1x1x4xf32>
    %237 = vector.shape_cast %236 : vector<1x1x4xf32> to vector<1x4xf32>
    %c26_i32 = arith.constant 26 : i32
    %238 = arith.addi %13, %c26_i32 : i32
    %c0_134 = arith.constant 0 : index
    %239 = arith.index_cast %238 : i32 to index
    %c0_135 = arith.constant 0 : index
    %240 = vector.load %arg2[%c0_134, %239, %c0_135] : memref<1x484x4xf32, #tpu.memory_space<vmem>>, vector<1x1x4xf32>
    %241 = vector.shape_cast %240 : vector<1x1x4xf32> to vector<1x4xf32>
    %c66_i32_136 = arith.constant 66 : i32
    %242 = arith.addi %13, %c66_i32_136 : i32
    %c0_137 = arith.constant 0 : index
    %243 = arith.index_cast %242 : i32 to index
    %c0_138 = arith.constant 0 : index
    %244 = vector.load %arg2[%c0_137, %243, %c0_138] : memref<1x484x4xf32, #tpu.memory_space<vmem>>, vector<1x1x4xf32>
    %245 = vector.shape_cast %244 : vector<1x1x4xf32> to vector<1x4xf32>
    %c68_i32_139 = arith.constant 68 : i32
    %246 = arith.addi %13, %c68_i32_139 : i32
    %c0_140 = arith.constant 0 : index
    %247 = arith.index_cast %246 : i32 to index
    %c0_141 = arith.constant 0 : index
    %248 = vector.load %arg2[%c0_140, %247, %c0_141] : memref<1x484x4xf32, #tpu.memory_space<vmem>>, vector<1x1x4xf32>
    %249 = vector.shape_cast %248 : vector<1x1x4xf32> to vector<1x4xf32>
    %c70_i32 = arith.constant 70 : i32
    %250 = arith.addi %13, %c70_i32 : i32
    %c0_142 = arith.constant 0 : index
    %251 = arith.index_cast %250 : i32 to index
    %c0_143 = arith.constant 0 : index
    %252 = vector.load %arg2[%c0_142, %251, %c0_143] : memref<1x484x4xf32, #tpu.memory_space<vmem>>, vector<1x1x4xf32>
    %253 = vector.shape_cast %252 : vector<1x1x4xf32> to vector<1x4xf32>
    %254 = tpu.concatenate %221, %225, %229, %233, %237, %241, %245, %249, %253 in 0 : vector<1x4xf32>, vector<1x4xf32>, vector<1x4xf32>, vector<1x4xf32>, vector<1x4xf32>, vector<1x4xf32>, vector<1x4xf32>, vector<1x4xf32>, vector<1x4xf32> -> vector<9x4xf32>
    %c5 = arith.constant 5 : index
    %c0_144 = arith.constant 0 : index
    %c0_145 = arith.constant 0 : index
    %255 = vector.load %arg3[%c5, %c0_144, %c0_145] : memref<9x4x4xf32, #tpu.memory_space<vmem>>, vector<1x4x4xf32>
    %256 = vector.shape_cast %255 : vector<1x4x4xf32> to vector<4x4xf32>
    %cst_146 = arith.constant dense<0.000000e+00> : vector<9x4xf32>
    %257 = tpu.matmul %254, %256, %cst_146 {dimension_numbers = #tpu.dot_dimension_numbers<[1], [0], [0], [1], [0, 0, 1, 1], [], []>} : vector<9x4xf32>, vector<4x4xf32>, vector<9x4xf32> -> vector<9x4xf32>
    %258 = arith.addf %217, %257 : vector<9x4xf32>
    %c-2_i32_147 = arith.constant -2 : i32
    %259 = arith.addi %13, %c-2_i32_147 : i32
    %c0_148 = arith.constant 0 : index
    %260 = arith.index_cast %259 : i32 to index
    %c0_149 = arith.constant 0 : index
    %261 = vector.load %arg2[%c0_148, %260, %c0_149] : memref<1x484x4xf32, #tpu.memory_space<vmem>>, vector<1x1x4xf32>
    %262 = vector.shape_cast %261 : vector<1x1x4xf32> to vector<1x4xf32>
    %c0_i32_150 = arith.constant 0 : i32
    %263 = arith.addi %13, %c0_i32_150 : i32
    %c0_151 = arith.constant 0 : index
    %264 = arith.index_cast %263 : i32 to index
    %c0_152 = arith.constant 0 : index
    %265 = vector.load %arg2[%c0_151, %264, %c0_152] : memref<1x484x4xf32, #tpu.memory_space<vmem>>, vector<1x1x4xf32>
    %266 = vector.shape_cast %265 : vector<1x1x4xf32> to vector<1x4xf32>
    %c2_i32_153 = arith.constant 2 : i32
    %267 = arith.addi %13, %c2_i32_153 : i32
    %c0_154 = arith.constant 0 : index
    %268 = arith.index_cast %267 : i32 to index
    %c0_155 = arith.constant 0 : index
    %269 = vector.load %arg2[%c0_154, %268, %c0_155] : memref<1x484x4xf32, #tpu.memory_space<vmem>>, vector<1x1x4xf32>
    %270 = vector.shape_cast %269 : vector<1x1x4xf32> to vector<1x4xf32>
    %c42_i32_156 = arith.constant 42 : i32
    %271 = arith.addi %13, %c42_i32_156 : i32
    %c0_157 = arith.constant 0 : index
    %272 = arith.index_cast %271 : i32 to index
    %c0_158 = arith.constant 0 : index
    %273 = vector.load %arg2[%c0_157, %272, %c0_158] : memref<1x484x4xf32, #tpu.memory_space<vmem>>, vector<1x1x4xf32>
    %274 = vector.shape_cast %273 : vector<1x1x4xf32> to vector<1x4xf32>
    %c44_i32_159 = arith.constant 44 : i32
    %275 = arith.addi %13, %c44_i32_159 : i32
    %c0_160 = arith.constant 0 : index
    %276 = arith.index_cast %275 : i32 to index
    %c0_161 = arith.constant 0 : index
    %277 = vector.load %arg2[%c0_160, %276, %c0_161] : memref<1x484x4xf32, #tpu.memory_space<vmem>>, vector<1x1x4xf32>
    %278 = vector.shape_cast %277 : vector<1x1x4xf32> to vector<1x4xf32>
    %c46_i32_162 = arith.constant 46 : i32
    %279 = arith.addi %13, %c46_i32_162 : i32
    %c0_163 = arith.constant 0 : index
    %280 = arith.index_cast %279 : i32 to index
    %c0_164 = arith.constant 0 : index
    %281 = vector.load %arg2[%c0_163, %280, %c0_164] : memref<1x484x4xf32, #tpu.memory_space<vmem>>, vector<1x1x4xf32>
    %282 = vector.shape_cast %281 : vector<1x1x4xf32> to vector<1x4xf32>
    %c86_i32 = arith.constant 86 : i32
    %283 = arith.addi %13, %c86_i32 : i32
    %c0_165 = arith.constant 0 : index
    %284 = arith.index_cast %283 : i32 to index
    %c0_166 = arith.constant 0 : index
    %285 = vector.load %arg2[%c0_165, %284, %c0_166] : memref<1x484x4xf32, #tpu.memory_space<vmem>>, vector<1x1x4xf32>
    %286 = vector.shape_cast %285 : vector<1x1x4xf32> to vector<1x4xf32>
    %c88_i32 = arith.constant 88 : i32
    %287 = arith.addi %13, %c88_i32 : i32
    %c0_167 = arith.constant 0 : index
    %288 = arith.index_cast %287 : i32 to index
    %c0_168 = arith.constant 0 : index
    %289 = vector.load %arg2[%c0_167, %288, %c0_168] : memref<1x484x4xf32, #tpu.memory_space<vmem>>, vector<1x1x4xf32>
    %290 = vector.shape_cast %289 : vector<1x1x4xf32> to vector<1x4xf32>
    %c90_i32 = arith.constant 90 : i32
    %291 = arith.addi %13, %c90_i32 : i32
    %c0_169 = arith.constant 0 : index
    %292 = arith.index_cast %291 : i32 to index
    %c0_170 = arith.constant 0 : index
    %293 = vector.load %arg2[%c0_169, %292, %c0_170] : memref<1x484x4xf32, #tpu.memory_space<vmem>>, vector<1x1x4xf32>
    %294 = vector.shape_cast %293 : vector<1x1x4xf32> to vector<1x4xf32>
    %295 = tpu.concatenate %262, %266, %270, %274, %278, %282, %286, %290, %294 in 0 : vector<1x4xf32>, vector<1x4xf32>, vector<1x4xf32>, vector<1x4xf32>, vector<1x4xf32>, vector<1x4xf32>, vector<1x4xf32>, vector<1x4xf32>, vector<1x4xf32> -> vector<9x4xf32>
    %c6 = arith.constant 6 : index
    %c0_171 = arith.constant 0 : index
    %c0_172 = arith.constant 0 : index
    %296 = vector.load %arg3[%c6, %c0_171, %c0_172] : memref<9x4x4xf32, #tpu.memory_space<vmem>>, vector<1x4x4xf32>
    %297 = vector.shape_cast %296 : vector<1x4x4xf32> to vector<4x4xf32>
    %cst_173 = arith.constant dense<0.000000e+00> : vector<9x4xf32>
    %298 = tpu.matmul %295, %297, %cst_173 {dimension_numbers = #tpu.dot_dimension_numbers<[1], [0], [0], [1], [0, 0, 1, 1], [], []>} : vector<9x4xf32>, vector<4x4xf32>, vector<9x4xf32> -> vector<9x4xf32>
    %299 = arith.addf %258, %298 : vector<9x4xf32>
    %c-1_i32_174 = arith.constant -1 : i32
    %300 = arith.addi %13, %c-1_i32_174 : i32
    %c0_175 = arith.constant 0 : index
    %301 = arith.index_cast %300 : i32 to index
    %c0_176 = arith.constant 0 : index
    %302 = vector.load %arg2[%c0_175, %301, %c0_176] : memref<1x484x4xf32, #tpu.memory_space<vmem>>, vector<1x1x4xf32>
    %303 = vector.shape_cast %302 : vector<1x1x4xf32> to vector<1x4xf32>
    %c1_i32_177 = arith.constant 1 : i32
    %304 = arith.addi %13, %c1_i32_177 : i32
    %c0_178 = arith.constant 0 : index
    %305 = arith.index_cast %304 : i32 to index
    %c0_179 = arith.constant 0 : index
    %306 = vector.load %arg2[%c0_178, %305, %c0_179] : memref<1x484x4xf32, #tpu.memory_space<vmem>>, vector<1x1x4xf32>
    %307 = vector.shape_cast %306 : vector<1x1x4xf32> to vector<1x4xf32>
    %c3_i32_180 = arith.constant 3 : i32
    %308 = arith.addi %13, %c3_i32_180 : i32
    %c0_181 = arith.constant 0 : index
    %309 = arith.index_cast %308 : i32 to index
    %c0_182 = arith.constant 0 : index
    %310 = vector.load %arg2[%c0_181, %309, %c0_182] : memref<1x484x4xf32, #tpu.memory_space<vmem>>, vector<1x1x4xf32>
    %311 = vector.shape_cast %310 : vector<1x1x4xf32> to vector<1x4xf32>
    %c43_i32_183 = arith.constant 43 : i32
    %312 = arith.addi %13, %c43_i32_183 : i32
    %c0_184 = arith.constant 0 : index
    %313 = arith.index_cast %312 : i32 to index
    %c0_185 = arith.constant 0 : index
    %314 = vector.load %arg2[%c0_184, %313, %c0_185] : memref<1x484x4xf32, #tpu.memory_space<vmem>>, vector<1x1x4xf32>
    %315 = vector.shape_cast %314 : vector<1x1x4xf32> to vector<1x4xf32>
    %c45_i32_186 = arith.constant 45 : i32
    %316 = arith.addi %13, %c45_i32_186 : i32
    %c0_187 = arith.constant 0 : index
    %317 = arith.index_cast %316 : i32 to index
    %c0_188 = arith.constant 0 : index
    %318 = vector.load %arg2[%c0_187, %317, %c0_188] : memref<1x484x4xf32, #tpu.memory_space<vmem>>, vector<1x1x4xf32>
    %319 = vector.shape_cast %318 : vector<1x1x4xf32> to vector<1x4xf32>
    %c47_i32_189 = arith.constant 47 : i32
    %320 = arith.addi %13, %c47_i32_189 : i32
    %c0_190 = arith.constant 0 : index
    %321 = arith.index_cast %320 : i32 to index
    %c0_191 = arith.constant 0 : index
    %322 = vector.load %arg2[%c0_190, %321, %c0_191] : memref<1x484x4xf32, #tpu.memory_space<vmem>>, vector<1x1x4xf32>
    %323 = vector.shape_cast %322 : vector<1x1x4xf32> to vector<1x4xf32>
    %c87_i32 = arith.constant 87 : i32
    %324 = arith.addi %13, %c87_i32 : i32
    %c0_192 = arith.constant 0 : index
    %325 = arith.index_cast %324 : i32 to index
    %c0_193 = arith.constant 0 : index
    %326 = vector.load %arg2[%c0_192, %325, %c0_193] : memref<1x484x4xf32, #tpu.memory_space<vmem>>, vector<1x1x4xf32>
    %327 = vector.shape_cast %326 : vector<1x1x4xf32> to vector<1x4xf32>
    %c89_i32 = arith.constant 89 : i32
    %328 = arith.addi %13, %c89_i32 : i32
    %c0_194 = arith.constant 0 : index
    %329 = arith.index_cast %328 : i32 to index
    %c0_195 = arith.constant 0 : index
    %330 = vector.load %arg2[%c0_194, %329, %c0_195] : memref<1x484x4xf32, #tpu.memory_space<vmem>>, vector<1x1x4xf32>
    %331 = vector.shape_cast %330 : vector<1x1x4xf32> to vector<1x4xf32>
    %c91_i32 = arith.constant 91 : i32
    %332 = arith.addi %13, %c91_i32 : i32
    %c0_196 = arith.constant 0 : index
    %333 = arith.index_cast %332 : i32 to index
    %c0_197 = arith.constant 0 : index
    %334 = vector.load %arg2[%c0_196, %333, %c0_197] : memref<1x484x4xf32, #tpu.memory_space<vmem>>, vector<1x1x4xf32>
    %335 = vector.shape_cast %334 : vector<1x1x4xf32> to vector<1x4xf32>
    %336 = tpu.concatenate %303, %307, %311, %315, %319, %323, %327, %331, %335 in 0 : vector<1x4xf32>, vector<1x4xf32>, vector<1x4xf32>, vector<1x4xf32>, vector<1x4xf32>, vector<1x4xf32>, vector<1x4xf32>, vector<1x4xf32>, vector<1x4xf32> -> vector<9x4xf32>
    %c7 = arith.constant 7 : index
    %c0_198 = arith.constant 0 : index
    %c0_199 = arith.constant 0 : index
    %337 = vector.load %arg3[%c7, %c0_198, %c0_199] : memref<9x4x4xf32, #tpu.memory_space<vmem>>, vector<1x4x4xf32>
    %338 = vector.shape_cast %337 : vector<1x4x4xf32> to vector<4x4xf32>
    %cst_200 = arith.constant dense<0.000000e+00> : vector<9x4xf32>
    %339 = tpu.matmul %336, %338, %cst_200 {dimension_numbers = #tpu.dot_dimension_numbers<[1], [0], [0], [1], [0, 0, 1, 1], [], []>} : vector<9x4xf32>, vector<4x4xf32>, vector<9x4xf32> -> vector<9x4xf32>
    %340 = arith.addf %299, %339 : vector<9x4xf32>
    %c0_i32_201 = arith.constant 0 : i32
    %341 = arith.addi %13, %c0_i32_201 : i32
    %c0_202 = arith.constant 0 : index
    %342 = arith.index_cast %341 : i32 to index
    %c0_203 = arith.constant 0 : index
    %343 = vector.load %arg2[%c0_202, %342, %c0_203] : memref<1x484x4xf32, #tpu.memory_space<vmem>>, vector<1x1x4xf32>
    %344 = vector.shape_cast %343 : vector<1x1x4xf32> to vector<1x4xf32>
    %c2_i32_204 = arith.constant 2 : i32
    %345 = arith.addi %13, %c2_i32_204 : i32
    %c0_205 = arith.constant 0 : index
    %346 = arith.index_cast %345 : i32 to index
    %c0_206 = arith.constant 0 : index
    %347 = vector.load %arg2[%c0_205, %346, %c0_206] : memref<1x484x4xf32, #tpu.memory_space<vmem>>, vector<1x1x4xf32>
    %348 = vector.shape_cast %347 : vector<1x1x4xf32> to vector<1x4xf32>
    %c4_i32_207 = arith.constant 4 : i32
    %349 = arith.addi %13, %c4_i32_207 : i32
    %c0_208 = arith.constant 0 : index
    %350 = arith.index_cast %349 : i32 to index
    %c0_209 = arith.constant 0 : index
    %351 = vector.load %arg2[%c0_208, %350, %c0_209] : memref<1x484x4xf32, #tpu.memory_space<vmem>>, vector<1x1x4xf32>
    %352 = vector.shape_cast %351 : vector<1x1x4xf32> to vector<1x4xf32>
    %c44_i32_210 = arith.constant 44 : i32
    %353 = arith.addi %13, %c44_i32_210 : i32
    %c0_211 = arith.constant 0 : index
    %354 = arith.index_cast %353 : i32 to index
    %c0_212 = arith.constant 0 : index
    %355 = vector.load %arg2[%c0_211, %354, %c0_212] : memref<1x484x4xf32, #tpu.memory_space<vmem>>, vector<1x1x4xf32>
    %356 = vector.shape_cast %355 : vector<1x1x4xf32> to vector<1x4xf32>
    %c46_i32_213 = arith.constant 46 : i32
    %357 = arith.addi %13, %c46_i32_213 : i32
    %c0_214 = arith.constant 0 : index
    %358 = arith.index_cast %357 : i32 to index
    %c0_215 = arith.constant 0 : index
    %359 = vector.load %arg2[%c0_214, %358, %c0_215] : memref<1x484x4xf32, #tpu.memory_space<vmem>>, vector<1x1x4xf32>
    %360 = vector.shape_cast %359 : vector<1x1x4xf32> to vector<1x4xf32>
    %c48_i32_216 = arith.constant 48 : i32
    %361 = arith.addi %13, %c48_i32_216 : i32
    %c0_217 = arith.constant 0 : index
    %362 = arith.index_cast %361 : i32 to index
    %c0_218 = arith.constant 0 : index
    %363 = vector.load %arg2[%c0_217, %362, %c0_218] : memref<1x484x4xf32, #tpu.memory_space<vmem>>, vector<1x1x4xf32>
    %364 = vector.shape_cast %363 : vector<1x1x4xf32> to vector<1x4xf32>
    %c88_i32_219 = arith.constant 88 : i32
    %365 = arith.addi %13, %c88_i32_219 : i32
    %c0_220 = arith.constant 0 : index
    %366 = arith.index_cast %365 : i32 to index
    %c0_221 = arith.constant 0 : index
    %367 = vector.load %arg2[%c0_220, %366, %c0_221] : memref<1x484x4xf32, #tpu.memory_space<vmem>>, vector<1x1x4xf32>
    %368 = vector.shape_cast %367 : vector<1x1x4xf32> to vector<1x4xf32>
    %c90_i32_222 = arith.constant 90 : i32
    %369 = arith.addi %13, %c90_i32_222 : i32
    %c0_223 = arith.constant 0 : index
    %370 = arith.index_cast %369 : i32 to index
    %c0_224 = arith.constant 0 : index
    %371 = vector.load %arg2[%c0_223, %370, %c0_224] : memref<1x484x4xf32, #tpu.memory_space<vmem>>, vector<1x1x4xf32>
    %372 = vector.shape_cast %371 : vector<1x1x4xf32> to vector<1x4xf32>
    %c92_i32 = arith.constant 92 : i32
    %373 = arith.addi %13, %c92_i32 : i32
    %c0_225 = arith.constant 0 : index
    %374 = arith.index_cast %373 : i32 to index
    %c0_226 = arith.constant 0 : index
    %375 = vector.load %arg2[%c0_225, %374, %c0_226] : memref<1x484x4xf32, #tpu.memory_space<vmem>>, vector<1x1x4xf32>
    %376 = vector.shape_cast %375 : vector<1x1x4xf32> to vector<1x4xf32>
    %377 = tpu.concatenate %344, %348, %352, %356, %360, %364, %368, %372, %376 in 0 : vector<1x4xf32>, vector<1x4xf32>, vector<1x4xf32>, vector<1x4xf32>, vector<1x4xf32>, vector<1x4xf32>, vector<1x4xf32>, vector<1x4xf32>, vector<1x4xf32> -> vector<9x4xf32>
    %c8 = arith.constant 8 : index
    %c0_227 = arith.constant 0 : index
    %c0_228 = arith.constant 0 : index
    %378 = vector.load %arg3[%c8, %c0_227, %c0_228] : memref<9x4x4xf32, #tpu.memory_space<vmem>>, vector<1x4x4xf32>
    %379 = vector.shape_cast %378 : vector<1x4x4xf32> to vector<4x4xf32>
    %cst_229 = arith.constant dense<0.000000e+00> : vector<9x4xf32>
    %380 = tpu.matmul %377, %379, %cst_229 {dimension_numbers = #tpu.dot_dimension_numbers<[1], [0], [0], [1], [0, 0, 1, 1], [], []>} : vector<9x4xf32>, vector<4x4xf32>, vector<9x4xf32> -> vector<9x4xf32>
    %381 = arith.addf %340, %380 : vector<9x4xf32>
    %c0_230 = arith.constant 0 : index
    %c0_231 = arith.constant 0 : index
    %382 = vector.load %arg4[%c0_230, %c0_231] : memref<4x4xf32, #tpu.memory_space<vmem>>, vector<1x4xf32>
    %383 = vector.broadcast %382 : vector<1x4xf32> to vector<9x4xf32>
    %384 = arith.addf %381, %383 : vector<9x4xf32>
    %cst_232 = arith.constant 0.000000e+00 : f32
    %385 = vector.broadcast %cst_232 : f32 to vector<9x4xf32>
    %386 = arith.maximumf %384, %385 : vector<9x4xf32>
    %c1_233 = arith.constant 1 : index
    %c0_234 = arith.constant 0 : index
    %387 = vector.load %arg4[%c1_233, %c0_234] : memref<4x4xf32, #tpu.memory_space<vmem>>, vector<1x4xf32>
    %388 = vector.broadcast %387 : vector<1x4xf32> to vector<9x4xf32>
    %389 = arith.mulf %386, %388 : vector<9x4xf32>
    %c2_235 = arith.constant 2 : index
    %c0_236 = arith.constant 0 : index
    %390 = vector.load %arg4[%c2_235, %c0_236] : memref<4x4xf32, #tpu.memory_space<vmem>>, vector<1x4xf32>
    %391 = vector.broadcast %390 : vector<1x4xf32> to vector<9x4xf32>
    %392 = arith.addf %389, %391 : vector<9x4xf32>
    %c3_237 = arith.constant 3 : index
    %c0_238 = arith.constant 0 : index
    %393 = vector.load %arg4[%c3_237, %c0_238] : memref<4x4xf32, #tpu.memory_space<vmem>>, vector<1x4xf32>
    %c-2_i32_239 = arith.constant -2 : i32
    %394 = arith.addi %3, %c-2_i32_239 : i32
    %c0_i32_240 = arith.constant 0 : i32
    %395 = arith.cmpi sge, %394, %c0_i32_240 : i32
    %c-2_i32_241 = arith.constant -2 : i32
    %396 = arith.addi %3, %c-2_i32_241 : i32
    %c15_i32_242 = arith.constant 15 : i32
    %397 = arith.cmpi sle, %396, %c15_i32_242 : i32
    %398 = arith.andi %395, %397 : i1
    %c-2_i32_243 = arith.constant -2 : i32
    %399 = arith.addi %7, %c-2_i32_243 : i32
    %c0_i32_244 = arith.constant 0 : i32
    %400 = arith.cmpi sge, %399, %c0_i32_244 : i32
    %c-2_i32_245 = arith.constant -2 : i32
    %401 = arith.addi %7, %c-2_i32_245 : i32
    %c15_i32_246 = arith.constant 15 : i32
    %402 = arith.cmpi sle, %401, %c15_i32_246 : i32
    %403 = arith.andi %400, %402 : i1
    %404 = arith.andi %398, %403 : i1
    %405 = arith.extui %404 : i1 to i32
    %406 = arith.sitofp %405 : i32 to f32
    %407 = vector.extract_strided_slice %392 {offsets = [0, 0], sizes = [1, 4], strides = [1, 1]} : vector<9x4xf32> to vector<1x4xf32>
    %c0_247 = arith.constant 0 : index
    %c0_248 = arith.constant 0 : index
    %c0_249 = arith.constant 0 : index
    %408 = vector.load %arg5[%c0_247, %c0_248, %c0_249] : memref<9x4x4xf32, #tpu.memory_space<vmem>>, vector<1x4x4xf32>
    %409 = vector.shape_cast %408 : vector<1x4x4xf32> to vector<4x4xf32>
    %cst_250 = arith.constant dense<0.000000e+00> : vector<1x4xf32>
    %410 = tpu.matmul %407, %409, %cst_250 {dimension_numbers = #tpu.dot_dimension_numbers<[1], [0], [0], [1], [0, 0, 1, 1], [], []>} : vector<1x4xf32>, vector<4x4xf32>, vector<1x4xf32> -> vector<1x4xf32>
    %411 = vector.broadcast %406 : f32 to vector<1x4xf32>
    %412 = arith.mulf %411, %410 : vector<1x4xf32>
    %413 = arith.addf %393, %412 : vector<1x4xf32>
    %c-2_i32_251 = arith.constant -2 : i32
    %414 = arith.addi %3, %c-2_i32_251 : i32
    %c0_i32_252 = arith.constant 0 : i32
    %415 = arith.cmpi sge, %414, %c0_i32_252 : i32
    %c-2_i32_253 = arith.constant -2 : i32
    %416 = arith.addi %3, %c-2_i32_253 : i32
    %c15_i32_254 = arith.constant 15 : i32
    %417 = arith.cmpi sle, %416, %c15_i32_254 : i32
    %418 = arith.andi %415, %417 : i1
    %c0_i32_255 = arith.constant 0 : i32
    %419 = arith.addi %7, %c0_i32_255 : i32
    %c0_i32_256 = arith.constant 0 : i32
    %420 = arith.cmpi sge, %419, %c0_i32_256 : i32
    %c0_i32_257 = arith.constant 0 : i32
    %421 = arith.addi %7, %c0_i32_257 : i32
    %c15_i32_258 = arith.constant 15 : i32
    %422 = arith.cmpi sle, %421, %c15_i32_258 : i32
    %423 = arith.andi %420, %422 : i1
    %424 = arith.andi %418, %423 : i1
    %425 = arith.extui %424 : i1 to i32
    %426 = arith.sitofp %425 : i32 to f32
    %427 = vector.extract_strided_slice %392 {offsets = [1, 0], sizes = [1, 4], strides = [1, 1]} : vector<9x4xf32> to vector<1x4xf32>
    %c1_259 = arith.constant 1 : index
    %c0_260 = arith.constant 0 : index
    %c0_261 = arith.constant 0 : index
    %428 = vector.load %arg5[%c1_259, %c0_260, %c0_261] : memref<9x4x4xf32, #tpu.memory_space<vmem>>, vector<1x4x4xf32>
    %429 = vector.shape_cast %428 : vector<1x4x4xf32> to vector<4x4xf32>
    %cst_262 = arith.constant dense<0.000000e+00> : vector<1x4xf32>
    %430 = tpu.matmul %427, %429, %cst_262 {dimension_numbers = #tpu.dot_dimension_numbers<[1], [0], [0], [1], [0, 0, 1, 1], [], []>} : vector<1x4xf32>, vector<4x4xf32>, vector<1x4xf32> -> vector<1x4xf32>
    %431 = vector.broadcast %426 : f32 to vector<1x4xf32>
    %432 = arith.mulf %431, %430 : vector<1x4xf32>
    %433 = arith.addf %413, %432 : vector<1x4xf32>
    %c-2_i32_263 = arith.constant -2 : i32
    %434 = arith.addi %3, %c-2_i32_263 : i32
    %c0_i32_264 = arith.constant 0 : i32
    %435 = arith.cmpi sge, %434, %c0_i32_264 : i32
    %c-2_i32_265 = arith.constant -2 : i32
    %436 = arith.addi %3, %c-2_i32_265 : i32
    %c15_i32_266 = arith.constant 15 : i32
    %437 = arith.cmpi sle, %436, %c15_i32_266 : i32
    %438 = arith.andi %435, %437 : i1
    %c2_i32_267 = arith.constant 2 : i32
    %439 = arith.addi %7, %c2_i32_267 : i32
    %c0_i32_268 = arith.constant 0 : i32
    %440 = arith.cmpi sge, %439, %c0_i32_268 : i32
    %c2_i32_269 = arith.constant 2 : i32
    %441 = arith.addi %7, %c2_i32_269 : i32
    %c15_i32_270 = arith.constant 15 : i32
    %442 = arith.cmpi sle, %441, %c15_i32_270 : i32
    %443 = arith.andi %440, %442 : i1
    %444 = arith.andi %438, %443 : i1
    %445 = arith.extui %444 : i1 to i32
    %446 = arith.sitofp %445 : i32 to f32
    %447 = vector.extract_strided_slice %392 {offsets = [2, 0], sizes = [1, 4], strides = [1, 1]} : vector<9x4xf32> to vector<1x4xf32>
    %c2_271 = arith.constant 2 : index
    %c0_272 = arith.constant 0 : index
    %c0_273 = arith.constant 0 : index
    %448 = vector.load %arg5[%c2_271, %c0_272, %c0_273] : memref<9x4x4xf32, #tpu.memory_space<vmem>>, vector<1x4x4xf32>
    %449 = vector.shape_cast %448 : vector<1x4x4xf32> to vector<4x4xf32>
    %cst_274 = arith.constant dense<0.000000e+00> : vector<1x4xf32>
    %450 = tpu.matmul %447, %449, %cst_274 {dimension_numbers = #tpu.dot_dimension_numbers<[1], [0], [0], [1], [0, 0, 1, 1], [], []>} : vector<1x4xf32>, vector<4x4xf32>, vector<1x4xf32> -> vector<1x4xf32>
    %451 = vector.broadcast %446 : f32 to vector<1x4xf32>
    %452 = arith.mulf %451, %450 : vector<1x4xf32>
    %453 = arith.addf %433, %452 : vector<1x4xf32>
    %c0_i32_275 = arith.constant 0 : i32
    %454 = arith.addi %3, %c0_i32_275 : i32
    %c0_i32_276 = arith.constant 0 : i32
    %455 = arith.cmpi sge, %454, %c0_i32_276 : i32
    %c0_i32_277 = arith.constant 0 : i32
    %456 = arith.addi %3, %c0_i32_277 : i32
    %c15_i32_278 = arith.constant 15 : i32
    %457 = arith.cmpi sle, %456, %c15_i32_278 : i32
    %458 = arith.andi %455, %457 : i1
    %c-2_i32_279 = arith.constant -2 : i32
    %459 = arith.addi %7, %c-2_i32_279 : i32
    %c0_i32_280 = arith.constant 0 : i32
    %460 = arith.cmpi sge, %459, %c0_i32_280 : i32
    %c-2_i32_281 = arith.constant -2 : i32
    %461 = arith.addi %7, %c-2_i32_281 : i32
    %c15_i32_282 = arith.constant 15 : i32
    %462 = arith.cmpi sle, %461, %c15_i32_282 : i32
    %463 = arith.andi %460, %462 : i1
    %464 = arith.andi %458, %463 : i1
    %465 = arith.extui %464 : i1 to i32
    %466 = arith.sitofp %465 : i32 to f32
    %467 = vector.extract_strided_slice %392 {offsets = [3, 0], sizes = [1, 4], strides = [1, 1]} : vector<9x4xf32> to vector<1x4xf32>
    %c3_283 = arith.constant 3 : index
    %c0_284 = arith.constant 0 : index
    %c0_285 = arith.constant 0 : index
    %468 = vector.load %arg5[%c3_283, %c0_284, %c0_285] : memref<9x4x4xf32, #tpu.memory_space<vmem>>, vector<1x4x4xf32>
    %469 = vector.shape_cast %468 : vector<1x4x4xf32> to vector<4x4xf32>
    %cst_286 = arith.constant dense<0.000000e+00> : vector<1x4xf32>
    %470 = tpu.matmul %467, %469, %cst_286 {dimension_numbers = #tpu.dot_dimension_numbers<[1], [0], [0], [1], [0, 0, 1, 1], [], []>} : vector<1x4xf32>, vector<4x4xf32>, vector<1x4xf32> -> vector<1x4xf32>
    %471 = vector.broadcast %466 : f32 to vector<1x4xf32>
    %472 = arith.mulf %471, %470 : vector<1x4xf32>
    %473 = arith.addf %453, %472 : vector<1x4xf32>
    %c0_i32_287 = arith.constant 0 : i32
    %474 = arith.addi %3, %c0_i32_287 : i32
    %c0_i32_288 = arith.constant 0 : i32
    %475 = arith.cmpi sge, %474, %c0_i32_288 : i32
    %c0_i32_289 = arith.constant 0 : i32
    %476 = arith.addi %3, %c0_i32_289 : i32
    %c15_i32_290 = arith.constant 15 : i32
    %477 = arith.cmpi sle, %476, %c15_i32_290 : i32
    %478 = arith.andi %475, %477 : i1
    %c0_i32_291 = arith.constant 0 : i32
    %479 = arith.addi %7, %c0_i32_291 : i32
    %c0_i32_292 = arith.constant 0 : i32
    %480 = arith.cmpi sge, %479, %c0_i32_292 : i32
    %c0_i32_293 = arith.constant 0 : i32
    %481 = arith.addi %7, %c0_i32_293 : i32
    %c15_i32_294 = arith.constant 15 : i32
    %482 = arith.cmpi sle, %481, %c15_i32_294 : i32
    %483 = arith.andi %480, %482 : i1
    %484 = arith.andi %478, %483 : i1
    %485 = arith.extui %484 : i1 to i32
    %486 = arith.sitofp %485 : i32 to f32
    %487 = vector.extract_strided_slice %392 {offsets = [4, 0], sizes = [1, 4], strides = [1, 1]} : vector<9x4xf32> to vector<1x4xf32>
    %c4_295 = arith.constant 4 : index
    %c0_296 = arith.constant 0 : index
    %c0_297 = arith.constant 0 : index
    %488 = vector.load %arg5[%c4_295, %c0_296, %c0_297] : memref<9x4x4xf32, #tpu.memory_space<vmem>>, vector<1x4x4xf32>
    %489 = vector.shape_cast %488 : vector<1x4x4xf32> to vector<4x4xf32>
    %cst_298 = arith.constant dense<0.000000e+00> : vector<1x4xf32>
    %490 = tpu.matmul %487, %489, %cst_298 {dimension_numbers = #tpu.dot_dimension_numbers<[1], [0], [0], [1], [0, 0, 1, 1], [], []>} : vector<1x4xf32>, vector<4x4xf32>, vector<1x4xf32> -> vector<1x4xf32>
    %491 = vector.broadcast %486 : f32 to vector<1x4xf32>
    %492 = arith.mulf %491, %490 : vector<1x4xf32>
    %493 = arith.addf %473, %492 : vector<1x4xf32>
    %c0_i32_299 = arith.constant 0 : i32
    %494 = arith.addi %3, %c0_i32_299 : i32
    %c0_i32_300 = arith.constant 0 : i32
    %495 = arith.cmpi sge, %494, %c0_i32_300 : i32
    %c0_i32_301 = arith.constant 0 : i32
    %496 = arith.addi %3, %c0_i32_301 : i32
    %c15_i32_302 = arith.constant 15 : i32
    %497 = arith.cmpi sle, %496, %c15_i32_302 : i32
    %498 = arith.andi %495, %497 : i1
    %c2_i32_303 = arith.constant 2 : i32
    %499 = arith.addi %7, %c2_i32_303 : i32
    %c0_i32_304 = arith.constant 0 : i32
    %500 = arith.cmpi sge, %499, %c0_i32_304 : i32
    %c2_i32_305 = arith.constant 2 : i32
    %501 = arith.addi %7, %c2_i32_305 : i32
    %c15_i32_306 = arith.constant 15 : i32
    %502 = arith.cmpi sle, %501, %c15_i32_306 : i32
    %503 = arith.andi %500, %502 : i1
    %504 = arith.andi %498, %503 : i1
    %505 = arith.extui %504 : i1 to i32
    %506 = arith.sitofp %505 : i32 to f32
    %507 = vector.extract_strided_slice %392 {offsets = [5, 0], sizes = [1, 4], strides = [1, 1]} : vector<9x4xf32> to vector<1x4xf32>
    %c5_307 = arith.constant 5 : index
    %c0_308 = arith.constant 0 : index
    %c0_309 = arith.constant 0 : index
    %508 = vector.load %arg5[%c5_307, %c0_308, %c0_309] : memref<9x4x4xf32, #tpu.memory_space<vmem>>, vector<1x4x4xf32>
    %509 = vector.shape_cast %508 : vector<1x4x4xf32> to vector<4x4xf32>
    %cst_310 = arith.constant dense<0.000000e+00> : vector<1x4xf32>
    %510 = tpu.matmul %507, %509, %cst_310 {dimension_numbers = #tpu.dot_dimension_numbers<[1], [0], [0], [1], [0, 0, 1, 1], [], []>} : vector<1x4xf32>, vector<4x4xf32>, vector<1x4xf32> -> vector<1x4xf32>
    %511 = vector.broadcast %506 : f32 to vector<1x4xf32>
    %512 = arith.mulf %511, %510 : vector<1x4xf32>
    %513 = arith.addf %493, %512 : vector<1x4xf32>
    %c2_i32_311 = arith.constant 2 : i32
    %514 = arith.addi %3, %c2_i32_311 : i32
    %c0_i32_312 = arith.constant 0 : i32
    %515 = arith.cmpi sge, %514, %c0_i32_312 : i32
    %c2_i32_313 = arith.constant 2 : i32
    %516 = arith.addi %3, %c2_i32_313 : i32
    %c15_i32_314 = arith.constant 15 : i32
    %517 = arith.cmpi sle, %516, %c15_i32_314 : i32
    %518 = arith.andi %515, %517 : i1
    %c-2_i32_315 = arith.constant -2 : i32
    %519 = arith.addi %7, %c-2_i32_315 : i32
    %c0_i32_316 = arith.constant 0 : i32
    %520 = arith.cmpi sge, %519, %c0_i32_316 : i32
    %c-2_i32_317 = arith.constant -2 : i32
    %521 = arith.addi %7, %c-2_i32_317 : i32
    %c15_i32_318 = arith.constant 15 : i32
    %522 = arith.cmpi sle, %521, %c15_i32_318 : i32
    %523 = arith.andi %520, %522 : i1
    %524 = arith.andi %518, %523 : i1
    %525 = arith.extui %524 : i1 to i32
    %526 = arith.sitofp %525 : i32 to f32
    %527 = vector.extract_strided_slice %392 {offsets = [6, 0], sizes = [1, 4], strides = [1, 1]} : vector<9x4xf32> to vector<1x4xf32>
    %c6_319 = arith.constant 6 : index
    %c0_320 = arith.constant 0 : index
    %c0_321 = arith.constant 0 : index
    %528 = vector.load %arg5[%c6_319, %c0_320, %c0_321] : memref<9x4x4xf32, #tpu.memory_space<vmem>>, vector<1x4x4xf32>
    %529 = vector.shape_cast %528 : vector<1x4x4xf32> to vector<4x4xf32>
    %cst_322 = arith.constant dense<0.000000e+00> : vector<1x4xf32>
    %530 = tpu.matmul %527, %529, %cst_322 {dimension_numbers = #tpu.dot_dimension_numbers<[1], [0], [0], [1], [0, 0, 1, 1], [], []>} : vector<1x4xf32>, vector<4x4xf32>, vector<1x4xf32> -> vector<1x4xf32>
    %531 = vector.broadcast %526 : f32 to vector<1x4xf32>
    %532 = arith.mulf %531, %530 : vector<1x4xf32>
    %533 = arith.addf %513, %532 : vector<1x4xf32>
    %c2_i32_323 = arith.constant 2 : i32
    %534 = arith.addi %3, %c2_i32_323 : i32
    %c0_i32_324 = arith.constant 0 : i32
    %535 = arith.cmpi sge, %534, %c0_i32_324 : i32
    %c2_i32_325 = arith.constant 2 : i32
    %536 = arith.addi %3, %c2_i32_325 : i32
    %c15_i32_326 = arith.constant 15 : i32
    %537 = arith.cmpi sle, %536, %c15_i32_326 : i32
    %538 = arith.andi %535, %537 : i1
    %c0_i32_327 = arith.constant 0 : i32
    %539 = arith.addi %7, %c0_i32_327 : i32
    %c0_i32_328 = arith.constant 0 : i32
    %540 = arith.cmpi sge, %539, %c0_i32_328 : i32
    %c0_i32_329 = arith.constant 0 : i32
    %541 = arith.addi %7, %c0_i32_329 : i32
    %c15_i32_330 = arith.constant 15 : i32
    %542 = arith.cmpi sle, %541, %c15_i32_330 : i32
    %543 = arith.andi %540, %542 : i1
    %544 = arith.andi %538, %543 : i1
    %545 = arith.extui %544 : i1 to i32
    %546 = arith.sitofp %545 : i32 to f32
    %547 = vector.extract_strided_slice %392 {offsets = [7, 0], sizes = [1, 4], strides = [1, 1]} : vector<9x4xf32> to vector<1x4xf32>
    %c7_331 = arith.constant 7 : index
    %c0_332 = arith.constant 0 : index
    %c0_333 = arith.constant 0 : index
    %548 = vector.load %arg5[%c7_331, %c0_332, %c0_333] : memref<9x4x4xf32, #tpu.memory_space<vmem>>, vector<1x4x4xf32>
    %549 = vector.shape_cast %548 : vector<1x4x4xf32> to vector<4x4xf32>
    %cst_334 = arith.constant dense<0.000000e+00> : vector<1x4xf32>
    %550 = tpu.matmul %547, %549, %cst_334 {dimension_numbers = #tpu.dot_dimension_numbers<[1], [0], [0], [1], [0, 0, 1, 1], [], []>} : vector<1x4xf32>, vector<4x4xf32>, vector<1x4xf32> -> vector<1x4xf32>
    %551 = vector.broadcast %546 : f32 to vector<1x4xf32>
    %552 = arith.mulf %551, %550 : vector<1x4xf32>
    %553 = arith.addf %533, %552 : vector<1x4xf32>
    %c2_i32_335 = arith.constant 2 : i32
    %554 = arith.addi %3, %c2_i32_335 : i32
    %c0_i32_336 = arith.constant 0 : i32
    %555 = arith.cmpi sge, %554, %c0_i32_336 : i32
    %c2_i32_337 = arith.constant 2 : i32
    %556 = arith.addi %3, %c2_i32_337 : i32
    %c15_i32_338 = arith.constant 15 : i32
    %557 = arith.cmpi sle, %556, %c15_i32_338 : i32
    %558 = arith.andi %555, %557 : i1
    %c2_i32_339 = arith.constant 2 : i32
    %559 = arith.addi %7, %c2_i32_339 : i32
    %c0_i32_340 = arith.constant 0 : i32
    %560 = arith.cmpi sge, %559, %c0_i32_340 : i32
    %c2_i32_341 = arith.constant 2 : i32
    %561 = arith.addi %7, %c2_i32_341 : i32
    %c15_i32_342 = arith.constant 15 : i32
    %562 = arith.cmpi sle, %561, %c15_i32_342 : i32
    %563 = arith.andi %560, %562 : i1
    %564 = arith.andi %558, %563 : i1
    %565 = arith.extui %564 : i1 to i32
    %566 = arith.sitofp %565 : i32 to f32
    %567 = vector.extract_strided_slice %392 {offsets = [8, 0], sizes = [1, 4], strides = [1, 1]} : vector<9x4xf32> to vector<1x4xf32>
    %c8_343 = arith.constant 8 : index
    %c0_344 = arith.constant 0 : index
    %c0_345 = arith.constant 0 : index
    %568 = vector.load %arg5[%c8_343, %c0_344, %c0_345] : memref<9x4x4xf32, #tpu.memory_space<vmem>>, vector<1x4x4xf32>
    %569 = vector.shape_cast %568 : vector<1x4x4xf32> to vector<4x4xf32>
    %cst_346 = arith.constant dense<0.000000e+00> : vector<1x4xf32>
    %570 = tpu.matmul %567, %569, %cst_346 {dimension_numbers = #tpu.dot_dimension_numbers<[1], [0], [0], [1], [0, 0, 1, 1], [], []>} : vector<1x4xf32>, vector<4x4xf32>, vector<1x4xf32> -> vector<1x4xf32>
    %571 = vector.broadcast %566 : f32 to vector<1x4xf32>
    %572 = arith.mulf %571, %570 : vector<1x4xf32>
    %573 = arith.addf %553, %572 : vector<1x4xf32>
    %c0_347 = arith.constant 0 : index
    %c0_348 = arith.constant 0 : index
    %574 = vector.load %arg6[%c0_347, %c0_348] : memref<4x8xf32, #tpu.memory_space<vmem>>, vector<4x8xf32>
    %cst_349 = arith.constant dense<0.000000e+00> : vector<1x8xf32>
    %575 = tpu.matmul %573, %574, %cst_349 {dimension_numbers = #tpu.dot_dimension_numbers<[1], [0], [0], [1], [0, 0, 1, 1], [], []>} : vector<1x4xf32>, vector<4x8xf32>, vector<1x8xf32> -> vector<1x8xf32>
    %c0_350 = arith.constant 0 : index
    %c0_351 = arith.constant 0 : index
    %576 = vector.load %arg7[%c0_350, %c0_351] : memref<1x8xf32, #tpu.memory_space<vmem>>, vector<1x8xf32>
    %577 = arith.addf %575, %576 : vector<1x8xf32>
    %578 = vector.shape_cast %577 : vector<1x8xf32> to vector<1x1x8xf32>
    %c0_352 = arith.constant 0 : index
    %c0_353 = arith.constant 0 : index
    %c0_354 = arith.constant 0 : index
    %579 = vector.load %arg8[%c0_352, %c0_353, %c0_354] : memref<1x1x8xf32, #tpu.memory_space<vmem>>, vector<1x1x8xf32>
    tpu.vector_store %arg8[%c0_352, %c0_353, %c0_354], %578 {strides = array<i32>} : memref<1x1x8xf32, #tpu.memory_space<vmem>>, vector<1x1x8xf32>,
    return
  }
  func.func @transform_0(%arg0: i32, %arg1: memref<4x2xi32, #tpu.memory_space<smem>>) -> (i32, i32, i32) {
    %c0_i32 = arith.constant 0 : i32
    %c0_i32_0 = arith.constant 0 : i32
    %c0_i32_1 = arith.constant 0 : i32
    return %arg0, %c0_i32, %c0_i32_0 : i32, i32, i32
  }
  func.func @transform_1(%arg0: i32, %arg1: memref<4x2xi32, #tpu.memory_space<smem>>) -> (i32, i32, i32) {
    %c0_i32 = arith.constant 0 : i32
    %c0_i32_0 = arith.constant 0 : i32
    %c0_i32_1 = arith.constant 0 : i32
    %c0_i32_2 = arith.constant 0 : i32
    return %c0_i32, %c0_i32_0, %c0_i32_1 : i32, i32, i32
  }
  func.func @transform_2(%arg0: i32, %arg1: memref<4x2xi32, #tpu.memory_space<smem>>) -> (i32, i32) {
    %c0_i32 = arith.constant 0 : i32
    %c0_i32_0 = arith.constant 0 : i32
    %c0_i32_1 = arith.constant 0 : i32
    return %c0_i32, %c0_i32_0 : i32, i32
  }
  func.func @transform_3(%arg0: i32, %arg1: memref<4x2xi32, #tpu.memory_space<smem>>) -> (i32, i32, i32) {
    %c0_i32 = arith.constant 0 : i32
    %c0_i32_0 = arith.constant 0 : i32
    %c0_i32_1 = arith.constant 0 : i32
    %c0_i32_2 = arith.constant 0 : i32
    return %c0_i32, %c0_i32_0, %c0_i32_1 : i32, i32, i32
  }
  func.func @transform_4(%arg0: i32, %arg1: memref<4x2xi32, #tpu.memory_space<smem>>) -> (i32, i32) {
    %c0_i32 = arith.constant 0 : i32
    %c0_i32_0 = arith.constant 0 : i32
    %c0_i32_1 = arith.constant 0 : i32
    return %c0_i32, %c0_i32_0 : i32, i32
  }
  func.func @transform_5(%arg0: i32, %arg1: memref<4x2xi32, #tpu.memory_space<smem>>) -> (i32, i32) {
    %c0_i32 = arith.constant 0 : i32
    %c0_i32_0 = arith.constant 0 : i32
    %c0_i32_1 = arith.constant 0 : i32
    return %c0_i32, %c0_i32_0 : i32, i32
  }
  func.func @transform_6(%arg0: i32, %arg1: memref<4x2xi32, #tpu.memory_space<smem>>) -> (i32, i32, i32) {
    %c0_i32 = arith.constant 0 : i32
    %c0_i32_0 = arith.constant 0 : i32
    %c0_i32_1 = arith.constant 0 : i32
    return %arg0, %c0_i32, %c0_i32_0 : i32, i32, i32
  }
}

</mosaic_0001>

<bundles_post_ra>
// kernel: tpu_custom_call.1
= control target key start
LH: loop header
LB: loop body
LE: loop exit
PB: predicated region body
PF: predicated region fallthrough
CT: control target
= control target key end

     0   :  { %s3672_s0 = inlined_call_operand.vmem [shape: s32[4,2], index: 0, kind: input, shape index: {}]   ;;  %s3673_s1 = inlined_call_operand.vmem [shape: f32[4,484,4], index: 1, kind: input, shape index: {}]   ;;  %s3674_s2 = inlined_call_operand.vmem [shape: f32[9,4,4], index: 2, kind: input, shape index: {}]   ;;  %s3675_s3 = inlined_call_operand.vmem [shape: f32[4,4], index: 3, kind: input, shape index: {}]   ;;  %s3676_s4 = inlined_call_operand.vmem [shape: f32[9,4,4], index: 4, kind: input, shape index: {}]   ;;  %s3677_s5 = inlined_call_operand.vmem [shape: f32[4,8], index: 5, kind: input, shape index: {}]   ;;  %s3678_s6 = inlined_call_operand.vmem [shape: f32[1,8], index: 6, kind: input, shape index: {}]   ;;  %s3679_s7 = inlined_call_operand.hbm [shape: f32[4,1,8], index: 7, kind: output, shape index: {}]  }
   0x1   :  { %3683 = sst [smem:[#allocation8_spill]] %s3673_s1  ;;  %s12_s26 = sshll.u32 %s3672_s0, 4  ;;  %s13_s26 = int_to_ptr.vmem [resolvable:$true] %s12_s26 }
   0x2   :  { %s2926_s27 = scalar_lea.vmem %s13_s26, 64  ;;  %p2931_p1 = scmp.lt.s32.totalorder %s13_s26, %s13_s26 }
   0x3   :  { %p2927_p0 = scmp.ne.s32.totalorder %s13_s26, %s2926_s27  ;;  %p2932_p2 = scmp.lt.s32.totalorder %s2926_s27, %s2926_s27 }
   0x5   :  { %p2933_p3 = por %p2932_p2, %p2931_p1 }
   0x7   :  { %p2934_p4 = pnand %p2933_p3, %p2927_p0 }
   0x9   :  { %2937 = shalt.err (!%p2934_p4)  }
   0xa   :  { %s3002_s28 = smov [#allocation3]  }
   0xb   :  { %15 = dma.vmem_to_smem %s13_s26, 64, %s3002_s28, [#allocation2] }
   0xc   :  { %2980 = dma.done.wait [#allocation2], 64 }
   0xd   :  { %2981 = vsyncadd [#allocation2], 4294967232 }
   0xe   :  { %17 = sfence }
   0xf   :  { %18 = vsyncpa [#allocation5], 0 }
  0x10   :  { %20 = vsyncpa [#allocation5 + $0x1], 0  ;;  %s3049_s29 = smov 0   ;;  %s3051_s30 = smov 0  }
  0x11   :  { %s3053_s0 = smov 0   ;;  %s3055_s8 = smov 0  }
  0x12 LB: > { %s3070_s9 = sadd.s32 4294967295, %s3000_s8   ;;  %s2595_s10 = sadd.s32 4294967294, %s3000_s8   ;;  %s3000_s8 = sphi %s3055_s8, %s3705_s8   ;;  %s2996_s0 = sphi %s3053_s0, %s3704_s0   ;;  %s2992_s30 = sphi %s3051_s30, %s3703_s30   ;;  %s2988_s29 = sphi %s3049_s29, %s3702_s29  }
  0x13   : > { %s3074_s11 = sadd.s32 1, %s3000_s8   ;;  %s164_s12 = sadd.s32 1, %s2996_s0 }
  0x14   : > { %s161_s13 = ssub.s32 %s3000_s8, %s3074_s11  ;;  %p174_p5 = scmp.ne.s32.totalorder %s2996_s0, %s2992_s30 }
  0x15   : > { %p162_p6 = scmp.eq.s32.totalorder %s161_s13, 0  ;;  %p175_p7 = scmp.eq.s32.totalorder %s3070_s9, 3 }
  0x16   : > { %p180_p8 = scmp.ne.s32.totalorder %s2992_s30, %s2988_s29  ;;  %p181_p9 = scmp.eq.s32.totalorder %s2595_s10, 3 }
  0x17   : > { %s3085_s14 = scalar_select %p162_p6, %s2996_s0, %s164_s12  }
  0x18   : > { %p3087_p10 = por %p175_p7, %p174_p5  ;;  %p3091_p11 = por %p181_p9, %p180_p8 }
  0x19   : > { %p2598_p12 = scmp.ge.s32.totalorder %s3000_s8, 1  ;;  %p222_p13 = scmp.lt.s32.totalorder %s3000_s8, 5 }
  0x1a   : > { %s3684_s15 = scalar_select %p3087_p10, 1, 0 }
  0x1b   : > { %s3685_s16 = scalar_select %p3091_p11, 1, 0 }
  0x1c   : > { %p223_p0 = pnand %p2598_p12, %p222_p13 }
  0x1d   : > { %p251_p1 = scmp.lt.s32.totalorder (!%p223_p0), %s3070_s9, 3  ;;  %s2600_s21 = sshll.u32 (!%p223_p0), %s3070_s9, 7 }
  0x1e   : > { %226 = sbr.rel (%p223_p0) target bundleno = 711 (0x2c7), region = 44  ;;  %s257_s25 = sld [smem:[#allocation3 + %s2600_s21]] (!%p223_p0) }
  0x1f   : > { %s262_s26 = sadd.s32 (!%p223_p0), 1, %s2600_s21  ;;  %s3686_s1 = sld [smem:[#allocation8_spill]] (!%p223_p0) }
  0x20   : > { %s263_s12 = sld [smem:[#allocation3 + %s262_s26]] (!%p223_p0) }
  0x23   : > { %vm325_vm0 = vcmask 1043456   ;;  %v2628_v0 = vld [vmem:[%s3674_s2 + $0x4] sm:$0xf]  ;;  %v333_v1 = vld [vmem:[%s3674_s2] sm:$0xf]  ;;  %s252_s22 = scalar_select %p251_p1, %s3070_s9, 3 }
  0x24   : > { %2788 = vmatprep.subr.msk.mxu0 %vm325_vm0, %v2628_v0  ;;  %2793 = vmatprep.subr.msk.mxu1 %vm325_vm0, %v333_v1  ;;  %v3113_v2 = vld [vmem:[%s3674_s2 + $0x8] sm:$0xf]  ;;  %v3120_v3 = vld [vmem:[%s3674_s2 + $0xc] sm:$0xf]  ;;  %p258_p2 = scmp.gt.s32.totalorder %s257_s25, 0  ;;  %p2601_p3 = scmp.lt.s32.totalorder %s257_s25, 15 }
  0x25   : > { %2789 = vmatpush3.msk.msra.mxu0 %vm325_vm0, %v2628_v0  ;;  %2794 = vmatpush3.msk.msra.mxu1 %vm325_vm0, %v333_v1  ;;  %s2883_s10 = smul.u32 488, %s252_s22  ;;  %vm319_vm1 = vcmask 1040384   ;;  %vm321_vm2 = vcmask 1041408   ;;  %vm323_vm3 = vcmask 1042432   ;;  %vm327_vm4 = vcmask 1044480  }
  0x26   : > { %2798 = vmatprep.subr.msk.mxu0 %vm325_vm0, %v3113_v2  ;;  %2803 = vmatprep.subr.msk.mxu1 %vm325_vm0, %v3120_v3  ;;  %p264_p4 = scmp.gt.s32.totalorder %s263_s12, 0  ;;  %p2606_p5 = scmp.lt.s32.totalorder %s263_s12, 15  ;;  %vm329_vm5 = vcmask 1045504   ;;  %vm331_vm6 = vcmask 1046528   ;;  %vm391_vm7 = vcmask 31744   ;;  %vm3004_vm8 = vmmov 0  }
  0x27   : > { %s3127_s18 = scalar_lea.vmem %s3686_s1, %s2883_s10  ;;  %s3707_s25 = smov (!%p258_p2, %s257_s25), 0  ;;  %v3200_v44 = vld [vmem:[%s3674_s2 + $0x10] sm:$0xf]  ;;  %vm2330_vm9 = vcmask 57344  }
  0x28   : > { %s3709_s12 = smov (!%p264_p4, %s263_s12), 0  ;;  %s3711_s25 = smov (!%p2601_p3, %s3707_s25), 15 }
  0x29   : > { %s3713_s12 = smov (!%p2606_p5, %s3709_s12), 15  ;;  %s2376_s19 = smul.u32 22, %s3711_s25 }
  0x2a   : > { %s3135_s20 = sadd.s32 2, %s3711_s25  ;;  %s3139_s22 = sadd.s32 2, %s3713_s12 }
  0x2b   : > { %s269_s21 = smul.u32 22, %s3135_s20  ;;  %s2377_s23 = sadd.s32 %s3713_s12, %s2376_s19 }
  0x2c   : > { %s3143_s24 = scalar_lea.vmem %s3127_s18, %s2377_s23  ;;  %s1467_s19 = sadd.s32 4294967294, %s3713_s12 }
  0x2d   : > { %v2619_v4 = vld [vmem:[%s3143_s24 + $0x1] sm:$0x1]  ;;  %v2620_v5 = vld [vmem:[%s3143_s24 + $0x3] sm:$0x1]  ;;  %v2621_v6 = vld [vmem:[%s3143_s24 + $0x5] sm:$0x1]  ;;  %s271_s26 = sadd.s32 %s3139_s22, %s269_s21 }
  0x2e   : > { %v2622_v7 = vld [vmem:[%s3143_s24 + $0x2d] sm:$0x1]  ;;  %v2623_v8 = vld [vmem:[%s3143_s24 + $0x2f] sm:$0x1]  ;;  %v3152_v9 = vld [vmem:[%s3143_s24 + $0x31] sm:$0x1] }
  0x2f   : > { %v3155_v10 = vld [vmem:[%s3143_s24 + $0x59] sm:$0x1]  ;;  %v3158_v11 = vld [vmem:[%s3143_s24 + $0x5b] sm:$0x1]  ;;  %v362_v12 = vrot.slane %v2620_v5, 7  ;;  %v365_v13 = vrot.slane %v2621_v6, 6 }
  0x30   : > { %v368_v14 = vrot.slane %v2622_v7, 5  ;;  %v371_v15 = vrot.slane %v2623_v8, 4  ;;  %v374_v16 = vrot.slane %v3152_v9, 3  ;;  %s272_s27 = sadd.s32 4294967250, %s271_s26  ;;  %v377_v17 = vrot.slane %v3155_v10, 2  ;;  %p1468_p8 = scmp.ge.s32.totalorder %s1467_s19, 0 }
  0x31   : > { %v380_v18 = vrot.slane %v3158_v11, 1  ;;  %v382_v19 = vsel %vm319_vm1, %v2619_v4, %v362_v12  ;;  %v1215_v20 = vrot.slane %v2623_v8, 7  ;;  %s273_s28 = scalar_lea.vmem %s3127_s18, %s272_s27  ;;  %v2611_v21 = vld [vmem:[%s3143_s24 + $0x2] sm:$0x1]  ;;  %v1217_v23 = vrot.slane %v3152_v9, 6  ;;  %p1469_p9 = scmp.le.s32.totalorder %s1467_s19, 15 }
  0x32   : > { %v383_v22 = vsel %vm321_vm2, %v382_v19, %v365_v13  ;;  %v1219_v24 = vrot.slane %v3155_v10, 5  ;;  %v274_v25 = vld [vmem:[%s273_s28] sm:$0x1]  ;;  %v2612_v26 = vld [vmem:[%s3143_s24 + $0x4] sm:$0x1]  ;;  %v299_v34 = vrot.slane %v2611_v21, 7 }
  0x33   : > { %v384_v27 = vsel %vm323_vm3, %v383_v22, %v368_v14  ;;  %v3172_v28 = vld [vmem:[%s3143_s24 + $0x2c] sm:$0x1]  ;;  %v3175_v29 = vld [vmem:[%s3143_s24 + $0x2e] sm:$0x1]  ;;  %v3178_v30 = vld [vmem:[%s3143_s24 + $0x30] sm:$0x1]  ;;  %v1231_v45 = vsel %vm319_vm1, %v2622_v7, %v1215_v20  ;;  %p1470_p13 = pnand %p1469_p9, %p1468_p8 }
  0x34   : > { %v385_v31 = vsel %vm325_vm0, %v384_v27, %v371_v15  ;;  %v3182_v32 = vld [vmem:[%s3143_s24 + $0x58] sm:$0x1]  ;;  %v3185_v33 = vld [vmem:[%s3143_s24 + $0x5a] sm:$0x1]  ;;  %v302_v35 = vrot.slane %v2612_v26, 6  ;;  %v1221_v37 = vrot.slane %v3158_v11, 4  ;;  %v320_v42 = vsel %vm319_vm1, %v274_v25, %v299_v34 }
  0x35   : > { %v386_v36 = vsel %vm327_vm4, %v385_v31, %v374_v16  ;;  %v305_v38 = vrot.slane %v3172_v28, 5  ;;  %v308_v39 = vrot.slane %v3175_v29, 4  ;;  %v311_v41 = vrot.slane %v3178_v30, 3  ;;  %v3195_v43 = vld [vmem:[%s3143_s24 + $0x5d] sm:$0x1]  ;;  %p3514_p1 = pneg %p1470_p13  ;;  %p1556_p2 = scmp.ge.s32.totalorder %s3713_s12, 0 }
  0x36   : > { %v387_v40 = vsel %vm329_vm5, %v386_v36, %v377_v17  ;;  %v314_v47 = vrot.slane %v3182_v32, 2  ;;  %v317_v48 = vrot.slane %v3185_v33, 1  ;;  %v322_v49 = vsel %vm321_vm2, %v320_v42, %v302_v35  ;;  %v3208_v50 = vld [vmem:[%s3143_s24 + $0x5c] sm:$0x1]  ;;  %v2635_v51 = vld [vmem:[%s3143_s24 + $0x6] sm:$0x1] }
  0x37   : > { %v388_v46 = vsel %vm331_vm6, %v387_v40, %v380_v18  ;;  %v324_v52 = vsel %vm323_vm3, %v322_v49, %v305_v38  ;;  %v569_v53 = vrot.slane %v2612_v26, 7  ;;  %v1095_v54 = vrot.slane %v3175_v29, 7  ;;  %v3216_v56 = vld [vmem:[%s3143_s24 + $0x32] sm:$0x1]  ;;  %v3225_v61 = vld [vmem:[%s3143_s24 + $0x18] sm:$0x1] }
  0x38   : > { %2790 = vmatprep.mubr.msk.f32.mxu0 %vm391_vm7, %v388_v46  ;;  %v1097_v55 = vrot.slane %v3178_v30, 6  ;;  %v326_v57 = vsel %vm325_vm0, %v324_v52, %v308_v39  ;;  %v1099_v58 = vrot.slane %v3182_v32, 5  ;;  %v1101_v59 = vrot.slane %v3185_v33, 4  ;;  %v2642_v1 = vld [vmem:[%s3143_s24 + $0x16] sm:$0x1]  ;;  %p1557_p3 = scmp.le.s32.totalorder %s3713_s12, 15 }
  0x39   : > { %v1329_v60 = vrot.slane %v3178_v30, 7  ;;  %2791 = vmatmul.mubr.msk.f32.vlgmr.msra.gmra.mxu0 %vm391_vm7, %v3195_v43  ;;  %v328_v62 = vsel %vm327_vm4, %v326_v57, %v311_v41  ;;  %v1333_v63 = vrot.slane %v3185_v33, 5  ;;  %v1223_v0 = vrot.slane %v3195_v43, 3  ;;  %v3234_v4 = vld [vmem:[%s3143_s24 + $0x1a] sm:$0x1]  ;;  %p1645_p4 = scmp.ge.s32.totalorder %s3139_s22, 0 }
  0x3a   : > { %2799 = vmatpush3.msk.msra.mxu0 %vm325_vm0, %v3113_v2  ;;  %v2645_v5 = vld [vmem:[%s3143_s24 + $0x42] sm:$0x1]  ;;  %v3238_v6 = vsel %vm321_vm2, %v1231_v45, %v1217_v23  ;;  %v330_v7 = vsel %vm329_vm5, %v328_v62, %v314_v47  ;;  %v572_v8 = vrot.slane %v2635_v51, 6  ;;  %v574_v9 = vrot.slane %v3175_v29, 5  ;;  %v3244_v13 = vld [vmem:[%s3143_s24 + $0x44] sm:$0x1] }
  0x3b   : > { %v576_v12 = vrot.slane %v3178_v30, 4  ;;  %2808 = vmatprep.subr.msk.mxu0 %vm325_vm0, %v3200_v44  ;;  %v3251_v2 = vld [vmem:[%s3674_s2 + $0x14] sm:$0xf]  ;;  %v332_v14 = vsel %vm331_vm6, %v330_v7, %v317_v48  ;;  %v583_v15 = vrot.slane %v3208_v50, 1  ;;  %v579_v16 = vrot.slane %v3216_v56, 3  ;;  %p1646_p5 = scmp.le.s32.totalorder %s3139_s22, 15 }
  0x3c   : > { %v585_v17 = vsel %vm319_vm1, %v2611_v21, %v569_v53  ;;  %v3258_v18 = vld [vmem:[%s3143_s24 + $0x46] sm:$0x1]  ;;  %v2648_v19 = vld [vmem:[%s3143_s24 + $0x6e] sm:$0x1]  ;;  %2795 = vmatprep.mubr.msk.f32.mxu1 %vm391_vm7, %v332_v14  ;;  %v581_v20 = vrot.slane %v3185_v33, 2  ;;  %v708_v25 = vrot.slane %v3225_v61, 7  ;;  %v1343_v10 = vsel %vm319_vm1, %v3175_v29, %v1329_v60 }
  0x3d   : > { %v586_v22 = vsel %vm321_vm2, %v585_v17, %v572_v8  ;;  %v3265_v23 = vld [vmem:[%s3143_s24 + $0x70] sm:$0x1]  ;;  %v711_v26 = vrot.slane %v3234_v4, 6  ;;  %2796 = vmatmul.mubr.msk.f32.vlgmr.msra.gmra.mxu1 %vm391_vm7, %v3208_v50  ;;  %v1103_v21 = vrot.slane %v3208_v50, 3  ;;  %v714_v31 = vrot.slane %v2645_v5, 5  ;;  %p3530_p8 = pnand %p1646_p5, %p1645_p4  ;;  %p1734_p9 = scmp.ge.s32.totalorder %s3711_s25, 0 }
  0x3e   : > { %v587_v27 = vsel %vm323_vm3, %v586_v22, %v574_v9  ;;  %v717_v34 = vrot.slane %v3244_v13, 4  ;;  %2804 = vmatpush3.msk.msra.mxu1 %vm325_vm0, %v3120_v3  ;;  %v720_v36 = vrot.slane %v3258_v18, 3  ;;  %v723_v38 = vrot.slane %v2648_v19, 2  ;;  %v3280_v40 = vld [vmem:[%s3143_s24 + $0x5e] sm:$0x1]  ;;  %p1993_p4 = scmp.ge.s32.totalorder %s3135_s20, 0 }
  0x3f   : > { %v588_v35 = vsel %vm325_vm0, %v587_v27, %v576_v12  ;;  %v728_v39 = vsel %vm319_vm1, %v2642_v1, %v708_v25  ;;  %v3283_v41 = vld [vmem:[%s3143_s24 + $0x72] sm:$0x1]  ;;  %v726_v45 = vrot.slane %v3265_v23, 1  ;;  %v975_v3 = vrot.slane %v3234_v4, 7  ;;  %2813 = vmatprep.subr.msk.mxu1 %vm325_vm0, %v3251_v2  ;;  %v2655_v47 = vld [vmem:[%s3143_s24 + $0x17] sm:$0x1] }
  0x40   : > { %v589_v42 = vsel %vm327_vm4, %v588_v35, %v579_v16  ;;  %v729_v46 = vsel %vm321_vm2, %v728_v39, %v711_v26  ;;  %v2656_v48 = vld [vmem:[%s3143_s24 + $0x19] sm:$0x1]  ;;  %v2657_v49 = vld [vmem:[%s3143_s24 + $0x1b] sm:$0x1]  ;;  %v980_v53 = vrot.slane %v3244_v13, 5  ;;  %v982_v57 = vrot.slane %v3258_v18, 4 }
  0x41   : > { %v590_v51 = vsel %vm329_vm5, %v589_v42, %v581_v20  ;;  %v730_v52 = vsel %vm323_vm3, %v729_v46, %v714_v31  ;;  %v2658_v62 = vld [vmem:[%s3143_s24 + $0x43] sm:$0x1]  ;;  %v2659_v1 = vld [vmem:[%s3143_s24 + $0x45] sm:$0x1]  ;;  %v3303_v4 = vld [vmem:[%s3674_s2 + $0x18] sm:$0xf]  ;;  %v991_v39 = vsel %vm319_vm1, %v3225_v61, %v975_v3 }
  0x42   : > { %v591_v5 = vsel %vm331_vm6, %v590_v51, %v583_v15  ;;  %v731_v7 = vsel %vm325_vm0, %v730_v52, %v717_v34  ;;  %v987_v8 = vrot.slane %v3265_v23, 2  ;;  %v989_v9 = vrot.slane %v3283_v41, 1  ;;  %v2660_v12 = vld [vmem:[%s3143_s24 + $0x47] sm:$0x1]  ;;  %v2661_v13 = vld [vmem:[%s3143_s24 + $0x6f] sm:$0x1] }
  0x43   : > { %2800 = vmatprep.mubr.msk.f32.mxu0 %vm391_vm7, %v591_v5  ;;  %v732_v14 = vsel %vm327_vm4, %v731_v7, %v720_v36  ;;  %v2662_v16 = vld [vmem:[%s3143_s24 + $0x71] sm:$0x1]  ;;  %v851_v17 = vrot.slane %v2656_v48, 7  ;;  %v854_v18 = vrot.slane %v2657_v49, 6  ;;  %v857_v19 = vrot.slane %v2658_v62, 5  ;;  %p1994_p5 = scmp.le.s32.totalorder %s3135_s20, 15 }
  0x44   : > { %v733_v15 = vsel %vm329_vm5, %v732_v14, %v723_v38  ;;  %2801 = vmatmul.mubr.msk.f32.vlgmr.msra.gmra.mxu0 %vm391_vm7, %v3280_v40  ;;  %v860_v20 = vrot.slane %v2659_v1, 4  ;;  %v863_v22 = vrot.slane %v2660_v12, 3  ;;  %v866_v23 = vrot.slane %v2661_v13, 2  ;;  %v2668_v25 = vld [vmem:[%s3143_s24 + $0x1c] sm:$0x1] }
  0x45   : > { %v734_v26 = vsel %vm331_vm6, %v733_v15, %v726_v45  ;;  %2809 = vmatpush3.msk.msra.mxu0 %vm325_vm0, %v3200_v44  ;;  %v869_v27 = vrot.slane %v2662_v16, 1  ;;  %v871_v31 = vsel %vm319_vm1, %v2655_v47, %v851_v17  ;;  %v2669_v34 = vld [vmem:[%s3143_s24 + $0x48] sm:$0x1]  ;;  %v978_v35 = vrot.slane %v2668_v25, 6  ;;  %v2685_v44 = vld [vmem:[%s3674_s2 + $0x1c] sm:$0xf] }
  0x46   : > { %2805 = vmatprep.mubr.msk.f32.mxu1 %vm391_vm7, %v734_v26  ;;  %v872_v36 = vsel %vm321_vm2, %v871_v31, %v854_v18  ;;  %v985_v38 = vrot.slane %v2669_v34, 3  ;;  %2818 = vmatprep.subr.msk.mxu0 %vm325_vm0, %v3303_v4  ;;  %v2675_v42 = vld [vmem:[%s3143_s24 + $0x84] sm:$0x1]  ;;  %v1111_v45 = vsel %vm319_vm1, %v3172_v28, %v1095_v54  ;;  %v2676_v3 = vld [vmem:[%s3143_s24 + $0x86] sm:$0x1]  ;;  %v1335_v52 = vrot.slane %v3208_v50, 4 }
  0x47   : > { %2806 = vmatmul.mubr.msk.f32.vlgmr.msra.gmra.mxu1 %vm391_vm7, %v3283_v41  ;;  %v873_v46 = vsel %vm323_vm3, %v872_v36, %v857_v19  ;;  %v992_v61 = vsel %vm321_vm2, %v991_v39, %v978_v35  ;;  %v1106_v47 = vrot.slane %v2675_v42, 2  ;;  %v1112_v48 = vsel %vm321_vm2, %v1111_v45, %v1097_v55  ;;  %v2682_v51 = vld [vmem:[%s3143_s24 + $0x85] sm:$0x1]  ;;  %v2663_v5 = vld [vmem:[%s3143_s24 + $0x73] sm:$0x1] }
  0x48   : > { %2814 = vmatpush3.msk.msra.mxu1 %vm325_vm0, %v3251_v2  ;;  %v874_v28 = vsel %vm325_vm0, %v873_v46, %v860_v20  ;;  %v993_v54 = vsel %vm323_vm3, %v992_v61, %v980_v53  ;;  %v1109_v41 = vrot.slane %v2676_v3, 1  ;;  %v1113_v49 = vsel %vm323_vm3, %v1112_v48, %v1099_v58  ;;  %v2683_v53 = vld [vmem:[%s3143_s24 + $0x87] sm:$0x1]  ;;  %v2670_v13 = vld [vmem:[%s3143_s24 + $0x74] sm:$0x1] }
  0x49   : > { %v875_v62 = vsel %vm327_vm4, %v874_v28, %v863_v22  ;;  %v994_v55 = vsel %vm325_vm0, %v993_v54, %v982_v57  ;;  %2823 = vmatprep.subr.msk.mxu1 %vm325_vm0, %v2685_v44  ;;  %v1114_v2 = vsel %vm325_vm0, %v1113_v49, %v1101_v59  ;;  %v1331_v32 = vrot.slane %v3216_v56, 6  ;;  %v2690_v18 = vld [vmem:[%s3674_s2 + $0x20] sm:$0xf]  ;;  %v2684_v60 = vld [vmem:[%s3143_s24 + $0x89] sm:$0x1] }
  0x4a   : > { %v876_v1 = vsel %vm329_vm5, %v875_v62, %v866_v23  ;;  %v995_v58 = vsel %vm327_vm4, %v994_v55, %v985_v38  ;;  %v1115_v7 = vsel %vm327_vm4, %v1114_v2, %v1103_v21  ;;  %v1226_v14 = vrot.slane %v2682_v51, 2  ;;  %v2677_v21 = vld [vmem:[%s3143_s24 + $0x88] sm:$0x1]  ;;  %v1476_v19 = vld [vmem:[%s3676_s4] sm:$0xf] }
  0x4b   : > { %v877_v57 = vsel %vm331_vm6, %v876_v1, %v869_v27  ;;  %v996_v12 = vsel %vm329_vm5, %v995_v58, %v987_v8  ;;  %v1116_v59 = vsel %vm329_vm5, %v1115_v7, %v1106_v47  ;;  %v1229_v17 = vrot.slane %v2683_v53, 1  ;;  %v2701_v15 = vld [vmem:[%s3676_s4 + $0x4] sm:$0xf]  ;;  %s3688_s23 = scalar_select %p3514_p1, 1, 0 }
  0x4c   : > { %2810 = vmatprep.mubr.msk.f32.mxu0 %vm391_vm7, %v877_v57  ;;  %v997_v56 = vsel %vm331_vm6, %v996_v12, %v989_v9  ;;  %v1117_v16 = vsel %vm331_vm6, %v1116_v59, %v1109_v41  ;;  %v1233_v50 = vsel %vm323_vm3, %v3238_v6, %v1219_v24  ;;  %v1337_v8 = vrot.slane %v3280_v40, 3 }
  0x4d   : > { %2815 = vmatprep.mubr.msk.f32.mxu1 %vm391_vm7, %v997_v56  ;;  %2811 = vmatmul.mubr.msk.f32.vlgmr.msra.gmra.mxu0 %vm391_vm7, %v2663_v5  ;;  %v1234_v9 = vsel %vm325_vm0, %v1233_v50, %v1221_v37  ;;  %v1339_v24 = vrot.slane %v2676_v3, 2  ;;  %v1344_v37 = vsel %vm321_vm2, %v1343_v10, %v1331_v32  ;;  %v1341_v29 = vrot.slane %v2677_v21, 1  ;;  %v2694_v5 = vld [vmem:[%s3675_s3] ss:$0 sm:$0xff] }
  0x4e   : > { %2816 = vmatmul.mubr.msk.f32.vlgmr.msra.gmra.mxu1 %vm391_vm7, %v2670_v13  ;;  %2819 = vmatpush3.msk.msra.mxu0 %vm325_vm0, %v3303_v4  ;;  %v1235_v11 = vsel %vm327_vm4, %v1234_v9, %v1223_v0  ;;  %v1345_v6 = vsel %vm323_vm3, %v1344_v37, %v1333_v63  ;;  %v2689_v4 = vld [vmem:[%s3143_s24 + $0x8a] sm:$0x1]  ;;  %v3003_v20 = vmov 0.0   ;;  %v2695_v13 = vld [vmem:[%s3675_s3 + $0x1] ss:$0 sm:$0xff]  ;;  %s1462_s24 = sadd.s32 4294967294, %s3711_s25 }
  0x4f   : > { %2824 = vmatpush3.msk.msra.mxu1 %vm325_vm0, %v2685_v44  ;;  %2820 = vmatprep.mubr.msk.f32.mxu0 %vm391_vm7, %v1117_v16  ;;  %v1236_v30 = vsel %vm329_vm5, %v1235_v11, %v1226_v14  ;;  %v1346_v43 = vsel %vm325_vm0, %v1345_v6, %v1335_v52  ;;  %v2696_v14 = vld [vmem:[%s3675_s3 + $0x2] ss:$0 sm:$0xff]  ;;  %p1463_p6 = scmp.ge.s32.totalorder %s1462_s24, 0  ;;  %p1464_p7 = scmp.le.s32.totalorder %s1462_s24, 15 }
  0x50   : > { %v1237_v40 = vsel %vm331_vm6, %v1236_v30, %v1229_v17  ;;  %2828 = vmatprep.subr.msk.mxu0 %vm325_vm0, %v2690_v18  ;;  %v1347_v0 = vsel %vm327_vm4, %v1346_v43, %v1337_v8  ;;  %2833 = vmatprep.subr.mxu1 %v3003_v20  ;;  %v2705_v17 = vld [vmem:[%s3676_s4 + $0x8] sm:$0xf]  ;;  %v2721_v30 = vld [vmem:[%s3676_s4 + $0x18] sm:$0xf]  ;;  %v2729_v43 = vld [vmem:[%s3676_s4 + $0x20] sm:$0xf] }
  0x51   : > { %2825 = vmatprep.mubr.msk.f32.mxu1 %vm391_vm7, %v1237_v40  ;;  %2821 = vmatmul.mubr.msk.f32.vlgmr.msra.gmra.mxu0 %vm391_vm7, %v2677_v21  ;;  %v1348_v33 = vsel %vm329_vm5, %v1347_v0, %v1339_v24  ;;  %v2709_v21 = vld [vmem:[%s3676_s4 + $0xc] sm:$0xf]  ;;  %v2717_v24 = vld [vmem:[%s3676_s4 + $0x14] sm:$0xf]  ;;  %p1465_p12 = pnand %p1464_p7, %p1463_p6  ;;  %p3526_p7 = pnand %p1557_p3, %p1556_p2 }
  0x52   : > { %2826 = vmatmul.mubr.msk.f32.vlgmr.msra.gmra.mxu1 %vm391_vm7, %v2684_v60  ;;  %2829 = vmatpush3.msk.msra.mxu0 %vm325_vm0, %v2690_v18  ;;  %v1349_v63 = vsel %vm331_vm6, %v1348_v33, %v1341_v29  ;;  %v2713_v18 = vld [vmem:[%s3676_s4 + $0x10] sm:$0xf]  ;;  %v2725_v60 = vld [vmem:[%s3676_s4 + $0x1c] sm:$0xf]  ;;  %p1648_p2 = pneg %p3530_p8 }
  0x53   : > { %2830 = vmatprep.mubr.msk.f32.mxu0 %vm391_vm7, %v1349_v63  ;;  %2838 = vmatprep.subr.mxu0 %v3003_v20  ;;  %p3510_p0 = pneg %p1465_p12  ;;  %p1735_p12 = scmp.le.s32.totalorder %s3711_s25, 15 }
  0x54   : > { %2834 = vmatpush3.msk.msra.mxu1 %vm325_vm0, %v1476_v19  ;;  %2835 = vmatprep.mubr.msk.f32.mxu1 %vm3004_vm8, %v3003_v20  ;;  %p1559_p13 = pneg %p3526_p7  ;;  %v1461_v19 = vld [vmem:[%s3675_s3 + $0x3] sm:$0x1]  ;;  %p3700_p7 = scmp.ne.s32.totalorder %s3684_s15, 0 }
  0x55   : > { %2831 = vmatmul.mubr.msk.f32.vlgmr.msra.gmra.mxu0 %vm391_vm7, %v2689_v4  ;;  %2843 = vmatprep.subr.mxu1 %v3003_v20  ;;  %v2252_v4 = vld [vmem:[%s3677_s5] sm:$0xf]  ;;  %p1472_p6 = pnand %p3514_p1, %p3510_p0  ;;  %p3540_p3 = pnand %p1735_p12, %p1734_p9 }
  0x56   : > { %2839 = vmatpush3.msk.msra.mxu0 %vm325_vm0, %v2701_v15  ;;  %2840 = vmatprep.mubr.msk.f32.mxu0 %vm3004_vm8, %v3003_v20  ;;  %p1560_p11 = pnand %p1559_p13, %p3510_p0  ;;  %p3558_p1 = pnand %p1994_p5, %p1993_p4 }
  0x57   : > { %2848 = vmatprep.subr.mxu0 %v3003_v20  ;;  %s2697_s12 = scalar_select %p1472_p6, 0, 1 }
  0x58   : > { %p1649_p6 = pnand %p1648_p2, %p3510_p0  ;;  %p1737_p10 = pneg %p3540_p3 }
  0x59   : > { %s2700_s28 = scalar_select %p1560_p11, 0, 1 }
  0x5a   : > { %s2704_s10 = scalar_select %p1649_p6, 0, 1 }
  0x5b   : > { %p3693_p9 = scmp.ne.s32.totalorder %s3688_s23, 0  ;;  %p1996_p0 = pneg %p3558_p1 }
  0x5c   : > { %s1475_s13 = scvt.s32.f32 %s2697_s12  ;;  %p3573_p3 = pnand %p1737_p10, %p1559_p13 }
  0x5d   : > { %p3564_p12 = pnand %p1737_p10, %p3693_p9  ;;  %s1563_s18 = scvt.s32.f32 %s2700_s28 }
  0x5e   : > { %p3580_p11 = pnand %p1737_p10, %p1648_p2  ;;  %s1652_s21 = scvt.s32.f32 %s2704_s10  ;;  %v1553_v63 = vstv %s1475_s13 }
  0x5f   : > { %s2708_s19 = scalar_select %p3564_p12, 0, 1 }
  0x60   : > { %p3591_p4 = pnand %p1996_p0, %p3693_p9  ;;  %p3608_p10 = pnand %p1996_p0, %p1559_p13 }
  0x61   : > { %s2712_s22 = scalar_select %p3573_p3, 0, 1 }
  0x62   : > { %s2716_s28 = scalar_select %p3580_p11, 0, 1 }
  0x63   : > { %s1741_s23 = scvt.s32.f32 %s2708_s19  ;;  %s1826_s1 = scvt.s32.f32 %s2712_s22 }
  0x64   : > { %s2720_s13 = scalar_select %p3591_p4, 0, 1 }
  0x65   : > { %p3620_p5 = pnand %p1996_p0, %p1648_p2  ;;  %s1911_s17 = scvt.s32.f32 %s2716_s28 }
  0x66   : > { %s2000_s24 = scvt.s32.f32 %s2720_s13  ;;  %s2734_s28 = sshll.u32 %s3070_s9, 4 }
  0x67   : > { %s2728_s27 = scalar_select %p3620_p5, 0, 1 }
  0x68   : > { %s3005_s9 = smov [#allocation4]  }
  0x69   : > { %s2170_s19 = scvt.s32.f32 %s2728_s27 }
  0xf9   : > { %v2792_v22 = vpop.f32.mrf.mxu0 }
  0xfb   : > { %v467_v25 = vpop.f32.mrf.mxu0 }
  0xfd   : > { %v2797_v23 = vpop.f32.mrf.mxu1 }
  0xfe   : > { %v557_v31 = vadd.f32 %v2797_v23, %v2792_v22 }
  0xff   : > { %v551_v26 = vpop.f32.mrf.mxu1 }
 0x100   : > { %v552_v34 = vadd.f32 %v551_v26, %v467_v25  ;;  %v1731_v26 = vstv %s1652_s21  ;;  %s249_s21 = sand.u32 1, %s2992_s30  }
 0x101   : > { %s250_s20 = scalar_lea.vmem [#allocation4], %s249_s21  ;;  %s2333_s26 = scalar_lea.sflag [#allocation5], %s249_s21 }
 0x104   : > { %v2802_v27 = vpop.f32.mrf.mxu0 }
 0x105   : > { %v679_v38 = vadd.f32 %v2802_v27, %v557_v31 }
 0x106   : > { %v669_v35 = vpop.f32.mrf.mxu0 }
 0x107   : > { %v2807_v36 = vpop.f32.mrf.mxu1  ;;  %v678_v39 = vadd.f32 %v669_v35, %v552_v34 }
 0x108   : > { %v822_v42 = vadd.f32 %v2807_v36, %v679_v38  ;;  %v1820_v36 = vstv %s1741_s23  ;;  %s2345_s23 = sshll.u32 %s250_s20, 4  ;;  %s2346_s23 = int_to_ptr.vmem [resolvable:$true] %s2345_s23 }
 0x109   : > { %v812_v44 = vpop.f32.mrf.mxu1 }
 0x10a   : > { %v821_v45 = vadd.f32 %v812_v44, %v678_v39 }
 0x10d   : > { %v2812_v46 = vpop.f32.mrf.mxu0 }
 0x10e   : > { %v2817_v61 = vpop.f32.mrf.mxu1  ;;  %v965_v47 = vadd.f32 %v2812_v46, %v822_v42 }
 0x10f   : > { %v955_v3 = vpop.f32.mrf.mxu0 }
 0x110   : > { %v964_v48 = vadd.f32 %v955_v3, %v821_v45  ;;  %v1075_v28 = vpop.f32.mrf.mxu1  ;;  %v1085_v52 = vadd.f32 %v2817_v61, %v965_v47  ;;  %v1905_v45 = vstv %s1826_s1  ;;  %s3637_s1 = scalar_lea.hbm %s3679_s7, %s2734_s28 }
 0x111   : > { %v2822_v54 = vpop.f32.mrf.mxu0 }
 0x112   : > { %v1084_v41 = vadd.f32 %v1075_v28, %v964_v48  ;;  %v2827_v49 = vpop.f32.mrf.mxu1  ;;  %v1205_v1 = vadd.f32 %v2822_v54, %v1085_v52  ;;  %v1990_v48 = vstv %s1911_s17  ;;  %s2938_s17 = scalar_lea.vmem %s2346_s23, 16 }
 0x113   : > { %v1195_v51 = vpop.f32.mrf.mxu0  ;;  %p2939_p1 = scmp.ne.s32.totalorder %s2346_s23, %s2938_s17 }
 0x114   : > { %v1204_v62 = vadd.f32 %v1195_v51, %v1084_v41  ;;  %v1315_v55 = vpop.f32.mrf.mxu1  ;;  %v1325_v57 = vadd.f32 %v2827_v49, %v1205_v1  ;;  %v2079_v51 = vstv %s2000_s24 }
 0x115   : > { %v2832_v2 = vpop.f32.mrf.mxu0  ;;  %p2940_p8 = pnand %p2939_p1, %p3700_p7 }
 0x116   : > { %v1324_v53 = vadd.f32 %v1315_v55, %v1204_v62  ;;  %v1437_v56 = vadd.f32 %v2832_v2, %v1325_v57 }
 0x117   : > { %v1427_v32 = vpop.f32.mrf.mxu0  ;;  %p2941_p13 = pneg %p2940_p8 }
 0x118   : > { %v1436_v58 = vadd.f32 %v1427_v32, %v1324_v53  ;;  %v1444_v8 = vadd.f32 %v2694_v5, %v1437_v56 }
 0x11a   : > { %v1443_v7 = vadd.f32 %v2694_v5, %v1436_v58  ;;  %v1446_v11 = vmax.f32 %v1444_v8, 0.0 }
 0x11c   : > { %v1445_v12 = vmax.f32 %v1443_v7, 0.0  ;;  %v1453_v6 = vmul.f32 %v2695_v13, %v1446_v11  ;;  %v2249_v7 = vstv %s2170_s19 }
 0x11e   : > { %v1452_v59 = vmul.f32 %v2695_v13, %v1445_v12  ;;  %v1460_v33 = vadd.f32 %v2696_v14, %v1453_v6 }
 0x120   : > { %v1459_v16 = vadd.f32 %v2696_v14, %v1452_v59 }
 0x122   : > { %2836 = vmatmul.mubr.msk.f32.vlgmr.msra.gmra.mxu1 %vm391_vm7, %v1459_v16  ;;  %v1566_v50 = vrot.slane %v1459_v16, 1  ;;  %v1655_v9 = vrot.slane %v1459_v16, 2  ;;  %v1744_v10 = vrot.slane %v1459_v16, 3  ;;  %v1829_v37 = vrot.slane %v1459_v16, 4 }
 0x123   : > { %2844 = vmatpush3.msk.msra.mxu1 %vm325_vm0, %v2705_v17  ;;  %2845 = vmatprep.mubr.msk.f32.mxu1 %vm3004_vm8, %v3003_v20  ;;  %v1914_v29 = vrot.slane %v1459_v16, 5  ;;  %v2003_v40 = vrot.slane %v1459_v16, 6  ;;  %v2088_v0 = vrot.slane %v1459_v16, 7 }
 0x124   : > { %2841 = vmatmul.mubr.msk.f32.vlgmr.msra.gmra.mxu0 %vm391_vm7, %v1566_v50  ;;  %2853 = vmatprep.subr.mxu1 %v3003_v20  ;;  %v2253_v50 = vld [vmem:[%s3678_s6] sm:$0x1] }
 0x125   : > { %2849 = vmatpush3.msk.msra.mxu0 %vm325_vm0, %v2709_v21  ;;  %2850 = vmatprep.mubr.msk.f32.mxu0 %vm3004_vm8, %v3003_v20 }
 0x126   : > { %2846 = vmatmul.mubr.msk.f32.vlgmr.msra.gmra.mxu1 %vm391_vm7, %v1655_v9  ;;  %2858 = vmatprep.subr.mxu0 %v3003_v20 }
 0x127   : > { %2854 = vmatpush3.msk.msra.mxu1 %vm325_vm0, %v2713_v18  ;;  %2855 = vmatprep.mubr.msk.f32.mxu1 %vm3004_vm8, %v3003_v20 }
 0x128   : > { %2851 = vmatmul.mubr.msk.f32.vlgmr.msra.gmra.mxu0 %vm391_vm7, %v1744_v10  ;;  %2863 = vmatprep.subr.mxu1 %v3003_v20 }
 0x129   : > { %2859 = vmatpush3.msk.msra.mxu0 %vm325_vm0, %v2717_v24  ;;  %2860 = vmatprep.mubr.msk.f32.mxu0 %vm3004_vm8, %v3003_v20 }
 0x12a   : > { %2856 = vmatmul.mubr.msk.f32.vlgmr.msra.gmra.mxu1 %vm391_vm7, %v1829_v37  ;;  %2868 = vmatprep.subr.mxu0 %v3003_v20 }
 0x12b   : > { %2864 = vmatpush3.msk.msra.mxu1 %vm325_vm0, %v2721_v30  ;;  %2865 = vmatprep.mubr.msk.f32.mxu1 %vm3004_vm8, %v3003_v20 }
 0x12c   : > { %2861 = vmatmul.mubr.msk.f32.vlgmr.msra.gmra.mxu0 %vm391_vm7, %v1914_v29  ;;  %2873 = vmatprep.subr.mxu1 %v3003_v20 }
 0x12d   : > { %2869 = vmatpush3.msk.msra.mxu0 %vm325_vm0, %v2725_v60  ;;  %2870 = vmatprep.mubr.msk.f32.mxu0 %vm3004_vm8, %v3003_v20 }
 0x12e   : > { %2866 = vmatmul.mubr.msk.f32.vlgmr.msra.gmra.mxu1 %vm391_vm7, %v2003_v40  ;;  %2878 = vmatprep.subr.mxu0 %v3003_v20 }
 0x12f   : > { %2874 = vmatpush3.msk.msra.mxu1 %vm325_vm0, %v2729_v43  ;;  %2875 = vmatprep.mubr.msk.f32.mxu1 %vm3004_vm8, %v3003_v20 }
 0x130   : > { %2871 = vmatmul.mubr.msk.f32.vlgmr.msra.gmra.mxu0 %vm391_vm7, %v2088_v0 }
 0x131   : > { %2880 = vmatprep.mubr.msk.f32.mxu0 %vm3004_vm8, %v3003_v20  ;;  %2879 = vmatpush3.msk.msra.mxu0 %vm325_vm0, %v2252_v4  ;;  %v1642_v20 = vstv %s1563_s18  ;;  %s2724_s18 = scalar_select %p3608_p10, 0, 1 }
 0x132   : > { %2876 = vmatmul.mubr.msk.f32.vlgmr.msra.gmra.mxu1 %vm391_vm7, %v1460_v33 }
 0x133   : > { %s2085_s25 = scvt.s32.f32 %s2724_s18  ;;  %s2942_s18 = sshll.u32 %s3005_s9, 4  ;;  %s2943_s18 = int_to_ptr.vmem [resolvable:$false] %s2942_s18 }
 0x134   : > { %s2944_s24 = scalar_lea.vmem %s2943_s18, 32  ;;  %p2945_p2 = scmp.lt.s32.totalorder %s2346_s23, %s2943_s18 }
 0x135   : > { %v2164_v53 = vstv %s2085_s25  ;;  %p2946_p6 = scmp.lt.s32.totalorder %s2944_s24, %s2938_s17 }
 0x137   : > { %p2947_p9 = por %p2946_p6, %p2945_p2 }
 0x139   : > { %p2948_p12 = pnand %p2947_p9, %p2941_p13 }
 0x1e2   : > { %v1549_v15 = vpop.f32.mrf.mxu1 }
 0x1e3   : > { %v1554_v22 = vmul.f32 %v1553_v63, %v1549_v15 }
 0x1e4   : > { %v2837_v23 = vpop.f32.mrf.mxu1  ;;  %v1638_v25 = vpop.f32.mrf.mxu0 }
 0x1e5   : > { %v1555_v27 = vadd.f32 %v1554_v22, %v1461_v19  ;;  %v1643_v31 = vmul.f32 %v1642_v20, %v1638_v25 }
 0x1e6   : > { %v2842_v34 = vpop.f32.mrf.mxu0  ;;  %v1727_v35 = vpop.f32.mrf.mxu1 }
 0x1e7   : > { %v1644_v38 = vadd.f32 %v1643_v31, %v1555_v27  ;;  %v1732_v39 = vmul.f32 %v1731_v26, %v1727_v35 }
 0x1e8   : > { %v2847_v44 = vpop.f32.mrf.mxu1  ;;  %v1816_v42 = vpop.f32.mrf.mxu0 }
 0x1e9   : > { %v1733_v46 = vadd.f32 %v1732_v39, %v1644_v38  ;;  %v1821_v61 = vmul.f32 %v1820_v36, %v1816_v42 }
 0x1ea   : > { %v2852_v3 = vpop.f32.mrf.mxu0  ;;  %v1901_v47 = vpop.f32.mrf.mxu1 }
 0x1eb   : > { %v1822_v28 = vadd.f32 %v1821_v61, %v1733_v46  ;;  %v1906_v54 = vmul.f32 %v1905_v45, %v1901_v47 }
 0x1ec   : > { %v2857_v41 = vpop.f32.mrf.mxu1  ;;  %v1986_v49 = vpop.f32.mrf.mxu0 }
 0x1ed   : > { %v1907_v52 = vadd.f32 %v1906_v54, %v1822_v28  ;;  %v1991_v62 = vmul.f32 %v1990_v48, %v1986_v49 }
 0x1ee   : > { %v2862_v55 = vpop.f32.mrf.mxu0  ;;  %v2075_v2 = vpop.f32.mrf.mxu1 }
 0x1ef   : > { %v1992_v32 = vadd.f32 %v1991_v62, %v1907_v52  ;;  %v2080_v1 = vmul.f32 %v2079_v51, %v2075_v2 }
 0x1f0   : > { %v2867_v58 = vpop.f32.mrf.mxu1  ;;  %v2160_v5 = vpop.f32.mrf.mxu0 }
 0x1f1   : > { %v2081_v57 = vadd.f32 %v2080_v1, %v1992_v32  ;;  %v2165_v12 = vmul.f32 %v2164_v53, %v2160_v5 }
 0x1f2   : > { %v2872_v13 = vpop.f32.mrf.mxu0  ;;  %v2245_v59 = vpop.f32.mrf.mxu1 }
 0x1f3   : > { %v2166_v14 = vadd.f32 %v2165_v12, %v2081_v57  ;;  %v2250_v56 = vmul.f32 %v2249_v7, %v2245_v59 }
 0x1f4   : > { %v2877_v16 = vpop.f32.mrf.mxu1 }
 0x1f5   : > { %v2251_v17 = vadd.f32 %v2250_v56, %v2166_v14 }
 0x1f7   : > { %2881 = vmatmul.mubr.msk.f32.vlgmr.msra.gmra.mxu0 %vm391_vm7, %v2251_v17 }
 0x2b7   : > { %v2326_v21 = vpop.f32.mrf.mxu0 }
 0x2b8   : > { %v2327_v8 = vadd.f32 %v2326_v21, %v2253_v50 }
 0x2b9   : > { %v2882_v9 = vpop.f32.mrf.mxu0 }
 0x2ba   : > { %2331 = vst.msk [vmem:[%s250_s20] sm:$0x1] %vm2330_vm9, %v2327_v8 }
 0x2bb   : > { %2951 = shalt.err (!%p2948_p12)
}
 0x2bc   : > { %s2952_s27 = scalar_lea.hbm %s3637_s1, 16  ;;  %s2956_s21 = scalar_lea.hbm %s3679_s7, 64 }
 0x2bd   : > { %p2953_p0 = scmp.ne.s32.totalorder %s3637_s1, %s2952_s27  ;;  %p2957_p4 = scmp.lt.s32.totalorder %s3637_s1, %s3679_s7 }
 0x2be   : > { %p2958_p10 = scmp.lt.s32.totalorder %s2956_s21, %s2952_s27 }
 0x2bf   : > { %p2954_p3 = pnand %p2953_p0, %p3700_p7 }
 0x2c0   : > { %p2959_p5 = por %p2958_p10, %p2957_p4 }
 0x2c1   : > { %p2955_p11 = pneg %p2954_p3 }
 0x2c3   : > { %p2960_p1 = pnand %p2959_p5, %p2955_p11 }
 0x2c5   : > { %2963 = shalt.err (!%p2960_p1)
}
 0x2c6   : > { %2884 = dma.vmem_to_hbm [thread:$0]  (%p3700_p7), %s2346_s23, 16, %s3637_s1, %s2333_s26  }
 0x2c7 PF: > { %p2890_p8 = scmp.ge.s32.totalorder %s3000_s8, 2  ;;  %s2357_s28 = sand.u32 1, %s2988_s29  }
 0x2c8   : > { %p3701_p13 = scmp.ne.s32.totalorder %s3685_s16, 0  ;;  %s2358_s20 = scalar_lea.sflag [#allocation5], %s2357_s28 }
 0x2ca   : > { %p2887_p2 = pnand %p2890_p8, %p3701_p13 }
 0x2cc   : > { %p2888_p6 = pneg %p2887_p2 }
 0x2ce   : > { %2983 = dma.done.wait (%p2888_p6), %s2358_s20, 16  }
 0x2cf   : > { %2985 = vsyncadd (%p2888_p6), %s2358_s20, 4294967280  ;;  %p23_p9 = scmp.ge.s32.totalorder %s3074_s11, 6   ;;  %s3702_s29 = smov %s2992_s30 }
 0x2d0   : > { %s3703_s30 = smov %s2996_s0  ;;  %s3704_s0 = smov %s3085_s14 }
 0x2d1   : > { %s3705_s8 = smov %s3074_s11  ;;  %25 = sbr.rel (!%p23_p9) target bundleno = 18 (0x12), region = 144 }
 0x2d6   :  { %2362 = vsyncpa [#allocation5], 1 }
 0x2d7   :  { %2364 = vsyncpa [#allocation5 + $0x1], 1 }

</bundles_post_ra>
